<compile_context>
chip_gen: v7x
topology: tpu7x:2x2x1
jax: 0.10.0
libtpu: 0.0.40
codegen_flags: <defaults>
</compile_context>

<pallas_src>
import jax
import jax.numpy as jnp
from jax import lax
from jax.experimental import pallas as pl
from jax.experimental.pallas import tpu as pltpu

# ---- model dims (small, consistent with the module) ----
B, T = 2, 8            # batch, time steps (split dim=1 in apply_backbone)
F_IN = 16              # per-timestep backbone input features
BFL = 24               # backbone_final_length
E = 32                 # embed_dim (= mamba d_model)
D_STATE = 16
D_CONV = 4
EXPAND = 2
D_INNER = EXPAND * E   # 64
DT_RANK = -(-E // 16)  # ceil(E/16) = 2
N_CLASSES = 5
OUT_PAD = 8            # padded output lane count (sliced back to 5 outside)
BN_EPS = 1e-5

# ---- packed weight buffer layout (row offsets) ----
R_E1, R_EIN, R_BCDT, R_ANEG, R_OF = 0, 16, 48, 112, 128
WMAT_ROWS = 192                                    # 16+32+64+16+64
V_BE1, V_BEIN, V_BCONV, V_BDT, V_DSKIP, V_BOF, V_CONVW = 0, 1, 2, 3, 4, 5, 6
WVEC_ROWS = 16


def _sigmoid(x):
    # numerically safe, single EUP tanh
    return 0.5 * (jnp.tanh(0.5 * x) + 1.0)


def _softplus(x):
    return jnp.maximum(x, 0.0) + jnp.log(1.0 + jnp.exp(-jnp.abs(x)))


# -------------------------------------------------------------------------
# Fused kernel: backbone + embed_layer + Mamba (selective scan) + fc
# Single program; rows = B*T tokens, lanes = features.
# -------------------------------------------------------------------------
def mamba_tcm_kernel(x_ref, wmat_ref, wvec_ref, o_ref):
    xb = x_ref[...]                                                        # (B*T, F_IN)

    # ---- backbone Linear ∘ embed Linear1 ∘ BatchNorm(eval) folded; ELU ----
    h = (jnp.dot(xb, wmat_ref[R_E1:R_E1 + F_IN, :E],
                 preferred_element_type=jnp.float32)
         + wvec_ref[V_BE1:V_BE1 + 1, :E])                                  # (B*T, E)
    h = jnp.where(h > 0, h, jnp.exp(jnp.minimum(h, 0.0)) - 1.0)            # ELU(alpha=1)

    # ---- embed Linear2 ∘ Mamba in_proj folded -> full 128-lane x|z ----
    xz = (jnp.dot(h, wmat_ref[R_EIN:R_EIN + E, :],
                  preferred_element_type=jnp.float32)
          + wvec_ref[V_BEIN:V_BEIN + 1, :])                                # (B*T, 2*DI)
    xc = xz[:, :D_INNER]                                                   # (B*T, DI)
    z = xz[:, D_INNER:]                                                    # (B*T, DI)

    # ---- causal depthwise conv1d (kernel D_CONV, left zero pad) + bias + SiLU ----
    row = lax.broadcasted_iota(jnp.int32, (T, D_INNER), 0)
    bconv = wvec_ref[V_BCONV:V_BCONV + 1, :D_INNER]

    def causal_conv(xt):                                                   # xt: (T, DI), one batch block
        acc = jnp.zeros((T, D_INNER), jnp.float32) + bconv
        for k in range(D_CONV):                                            # static unroll
            shift = D_CONV - 1 - k
            w_k = wvec_ref[V_CONVW + k:V_CONVW + k + 1, :D_INNER]          # (1, DI)
            if shift == 0:
                xs = xt
            else:
                xs = pltpu.roll(xt, shift, axis=0)                         # xs[l] = xt[l-shift] (wrapped)
                xs = jnp.where(row >= shift, xs, 0.0)                      # zero the wrap-around
            acc = acc + xs * w_k
        return acc

    conv = jnp.concatenate([causal_conv(xc[:T, :]), causal_conv(xc[T:, :])], axis=0)
    x_act = conv * _sigmoid(conv)                                          # SiLU, (B*T, DI)

    # ---- fused x_proj [dt | B | C] (x_proj_dt ∘ dt_proj folded): one matmul ----
    bcdt = jnp.dot(x_act, wmat_ref[R_BCDT:R_BCDT + D_INNER, :D_INNER + 2 * D_STATE],
                   preferred_element_type=jnp.float32)                     # (B*T, DI+2N)
    delta = _softplus(bcdt[:, :D_INNER] + wvec_ref[V_BDT:V_BDT + 1, :D_INNER])   # (B*T, DI)
    bm = bcdt[:, D_INNER:D_INNER + D_STATE]                                # (B*T, N)
    cm = bcdt[:, D_INNER + D_STATE:D_INNER + 2 * D_STATE]                  # (B*T, N)
    dx = delta * x_act                                                     # (B*T, DI)

    # ---- selective scan: per-step factors batched & hoisted, loop = pure VPU fma ----
    a_neg = wmat_ref[R_ANEG:R_ANEG + D_STATE, :D_INNER]                    # (N, DI): A = -exp(A_log), transposed
    a_rep = jnp.concatenate([a_neg] * T, axis=0)                           # (T*N, DI)

    # block-diagonal selector blk[l, 16*l+n] = 1 (built from iota, no division)
    lane = lax.broadcasted_iota(jnp.int32, (T, T * D_STATE), 1)
    rowl = lax.broadcasted_iota(jnp.int32, (T, T * D_STATE), 0)
    blk = jnp.where((lane >= rowl * D_STATE) & (lane < (rowl + 1) * D_STATE), 1.0, 0.0)
    # row replicator rep[16*l+n, l] = 1  (delta row l -> rows 16l..16l+15)
    rrow = lax.broadcasted_iota(jnp.int32, (T * D_STATE, T), 0)
    rlane = lax.broadcasted_iota(jnp.int32, (T * D_STATE, T), 1)
    rep = jnp.where((rrow >= rlane * D_STATE) & (rrow < (rlane + 1) * D_STATE), 1.0, 0.0)

    ys = []
    for b in range(B):                                                     # two independent chains
        sl = slice(b * T, (b + 1) * T)
        # dA[16l+n, d] = exp(delta_l[d] * A[n, d])   -- one dense EUP exp over (T*N, DI)
        dA = jnp.exp(jnp.dot(rep, delta[sl], preferred_element_type=jnp.float32) * a_rep)
        # dBu[16l+n, d] = B_l[n] * (delta*x)_l[d]    -- ONE block-diagonal MXU matmul
        b_bd = blk * jnp.concatenate([bm[sl]] * T, axis=1)                 # (T, T*N)
        dbu = lax.dot_general(b_bd, dx[sl], (((0,), (0,)), ((), ())),
                              preferred_element_type=jnp.float32)          # (T*N, DI)
        # serial carry: statically unrolled, pure fma on (N, DI)
        hcar = jnp.zeros((D_STATE, D_INNER), jnp.float32)
        hs = []
        for l in range(T):
            r0 = l * D_STATE
            hcar = dA[r0:r0 + D_STATE, :] * hcar + dbu[r0:r0 + D_STATE, :]
            hs.append(hcar)
        h_all = jnp.concatenate(hs, axis=0)                                # (T*N, DI)
        # y_l[d] = sum_n C_l[n] * h_l[n, d]          -- ONE block-diagonal MXU matmul
        c_bd = blk * jnp.concatenate([cm[sl]] * T, axis=1)                 # (T, T*N)
        ys.append(jnp.dot(c_bd, h_all, preferred_element_type=jnp.float32))  # (T, DI)
    y = jnp.concatenate(ys, axis=0)                                        # (B*T, DI)

    # ---- skip (+ u * D), SiLU(z) gate, out_proj ∘ fc (padded to 8 lanes) ----
    y = y + x_act * wvec_ref[V_DSKIP:V_DSKIP + 1, :D_INNER]
    y = y * (z * _sigmoid(z))
    out = (jnp.dot(y, wmat_ref[R_OF:R_OF + D_INNER, :OUT_PAD],
                   preferred_element_type=jnp.float32)
           + wvec_ref[V_BOF:V_BOF + 1, :OUT_PAD])                          # (B*T, 8)
    o_ref[...] = out


# -------------------------------------------------------------------------
# Exact algebraic parameter folds + packing into two lane-padded buffers
# (done once, outside the kernel)
# -------------------------------------------------------------------------
def fuse_and_pack(p):
    # eval-mode BatchNorm is a per-feature affine -> fold into embed Linear 1
    scale = p["bn_g"] * lax.rsqrt(p["bn_rv"] + BN_EPS)                     # (1, E)
    shift = p["bn_b"] - p["bn_rm"] * scale
    w1f = p["w1"] * scale
    b1f = p["b1"] * scale + shift
    # backbone Linear ∘ embed Linear1 (no nonlinearity between)
    w_e1 = jnp.dot(p["wbb"], w1f)                                          # (F_IN, E)
    b_e1 = jnp.dot(p["bbb"], w1f) + b1f                                    # (1, E)
    # embed Linear2 ∘ in_proj (both linear/affine, ELU is before Linear2)
    w_in = jnp.concatenate([p["winx"], p["winz"]], axis=1)                 # (E, 2*DI)
    w_ein = jnp.dot(p["w2"], w_in)                                         # (E, 2*DI)
    b_ein = jnp.dot(p["b2"], w_in)                                         # (1, 2*DI)
    # x_proj(dt) ∘ dt_proj fused with B|C into one weight, column order [dt | B | C]
    w_bcdt = jnp.concatenate([jnp.dot(p["wxdt"], p["wdt"]), p["wxb"], p["wxc"]], axis=1)
    a_neg = -jnp.exp(p["alogT"])                                           # (N, DI)
    # out_proj ∘ fc, zero-padded 5 -> 8 output lanes
    w_of = jnp.zeros((D_INNER, OUT_PAD), jnp.float32).at[:, :N_CLASSES].set(
        jnp.dot(p["wout"], p["wfc"]))
    b_of = jnp.zeros((1, OUT_PAD), jnp.float32).at[:, :N_CLASSES].set(p["bfc"])

    wmat = jnp.zeros((WMAT_ROWS, 128), jnp.float32)
    wmat = wmat.at[R_E1:R_E1 + F_IN, :E].set(w_e1)
    wmat = wmat.at[R_EIN:R_EIN + E, :2 * D_INNER].set(w_ein)
    wmat = wmat.at[R_BCDT:R_BCDT + D_INNER, :D_INNER + 2 * D_STATE].set(w_bcdt)
    wmat = wmat.at[R_ANEG:R_ANEG + D_STATE, :D_INNER].set(a_neg)
    wmat = wmat.at[R_OF:R_OF + D_INNER, :OUT_PAD].set(w_of)

    wvec = jnp.zeros((WVEC_ROWS, 128), jnp.float32)
    wvec = wvec.at[V_BE1, :E].set(b_e1[0])
    wvec = wvec.at[V_BEIN, :2 * D_INNER].set(b_ein[0])
    wvec = wvec.at[V_BCONV, :D_INNER].set(p["bconv"][0])
    wvec = wvec.at[V_BDT, :D_INNER].set(p["bdt"][0])
    wvec = wvec.at[V_DSKIP, :D_INNER].set(p["dskip"][0])
    wvec = wvec.at[V_BOF, :OUT_PAD].set(b_of[0])
    wvec = wvec.at[V_CONVW:V_CONVW + D_CONV, :D_INNER].set(p["wconv"])
    return wmat, wvec


# -------------------------------------------------------------------------
# Wrapper: one pallas_call, single grid step, two weight DMAs
# -------------------------------------------------------------------------
def mamba_tcm_forward(x, wmat, wvec):
    assert x.shape == (B, T, F_IN)
    x2 = x.reshape(B * T, F_IN)
    out = pl.pallas_call(
        mamba_tcm_kernel,
        out_shape=jax.ShapeDtypeStruct((B * T, OUT_PAD), jnp.float32),
        grid=(1,),
        in_specs=[pl.BlockSpec((B * T, F_IN), lambda i: (0, 0)),
                  pl.BlockSpec((WMAT_ROWS, 128), lambda i: (0, 0)),
                  pl.BlockSpec((WVEC_ROWS, 128), lambda i: (0, 0))],
        out_specs=pl.BlockSpec((B * T, OUT_PAD), lambda i: (0, 0)),
        compiler_params=pltpu.CompilerParams(dimension_semantics=("arbitrary",)),
    )(x2, wmat, wvec)
    return out.reshape(B, T, OUT_PAD)[:, :, :N_CLASSES]


# -------------------------------------------------------------------------
# Deterministic module-style parameters (weights pre-transposed to
# (in_features, out_features); 1-D params reshaped to (1, N))
# -------------------------------------------------------------------------
def make_params(key):
    ks = jax.random.split(key, 20)
    s = 0.15

    def rnd(i, shape):
        return s * jax.random.normal(ks[i], shape, dtype=jnp.float32)

    p = {}
    p["wbb"] = rnd(0, (F_IN, BFL))          # synthetic backbone Linear
    p["bbb"] = rnd(1, (1, BFL))
    p["w1"] = rnd(2, (BFL, E))              # embed_layer Linear 1
    p["b1"] = rnd(3, (1, E))
    p["bn_g"] = jnp.ones((1, E), jnp.float32)
    p["bn_b"] = jnp.zeros((1, E), jnp.float32)
    p["bn_rm"] = jnp.zeros((1, E), jnp.float32)
    p["bn_rv"] = jnp.ones((1, E), jnp.float32)
    p["w2"] = rnd(4, (E, E))                # embed_layer Linear 2
    p["b2"] = rnd(5, (1, E))
    # Mamba
    p["winx"] = rnd(6, (E, D_INNER))        # in_proj (x half), no bias
    p["winz"] = rnd(7, (E, D_INNER))        # in_proj (z half), no bias
    p["wconv"] = rnd(8, (D_CONV, D_INNER))  # depthwise conv weight (tap, channel)
    p["bconv"] = rnd(9, (1, D_INNER))
    p["wxdt"] = rnd(10, (D_INNER, DT_RANK))
    p["wxb"] = rnd(11, (D_INNER, D_STATE))
    p["wxc"] = rnd(12, (D_INNER, D_STATE))
    p["wdt"] = rnd(13, (DT_RANK, D_INNER))
    p["bdt"] = rnd(14, (1, D_INNER))
    # A_log init: A[d, n] = n+1  -> stored transposed as (N, DI)
    p["alogT"] = (jnp.log(jnp.arange(1, D_STATE + 1, dtype=jnp.float32))[:, None]
                  * jnp.ones((1, D_INNER), jnp.float32))
    p["dskip"] = jnp.ones((1, D_INNER), jnp.float32)   # D
    p["wout"] = rnd(15, (D_INNER, E))       # out_proj, no bias
    # final fc
    p["wfc"] = rnd(16, (E, N_CLASSES))
    p["bfc"] = rnd(17, (1, N_CLASSES))
    return p


if __name__ == "__main__":
    x = jax.random.normal(jax.random.PRNGKey(0), (B, T, F_IN), dtype=jnp.float32)
    params = make_params(jax.random.PRNGKey(42))
    wmat, wvec = fuse_and_pack(params)      # one-time parameter fold + packing
    out = mamba_tcm_forward(x, wmat, wvec)
    out = jax.block_until_ready(out)
    assert out.shape == (B, T, N_CLASSES), out.shape
    assert bool(jnp.all(jnp.isfinite(out)))
    print("KERNEL_OK")
</pallas_src>

<mosaic_0001>
module attributes {stable_mosaic.version = 11 : i64} {
  func.func @mamba_tcm_kernel(%arg0: i32, %arg1: memref<16x16xf32, #tpu.memory_space<vmem>>, %arg2: memref<192x128xf32, #tpu.memory_space<vmem>>, %arg3: memref<16x128xf32, #tpu.memory_space<vmem>>, %arg4: memref<16x8xf32, #tpu.memory_space<vmem>>) attributes {dimension_semantics = [#tpu.dimension_semantics<arbitrary>], iteration_bounds = array<i64: 1>, scalar_prefetch = 0 : i64, scratch_operands = 0 : i64, tpu.core_type = #tpu.core_type<tc>, window_params = [{pipeline_mode = #tpu.pipeline_mode<synchronous>, transform_indices = @transform_0, window_bounds = array<i64: 16, 16>}, {pipeline_mode = #tpu.pipeline_mode<synchronous>, transform_indices = @transform_1, window_bounds = array<i64: 192, 128>}, {pipeline_mode = #tpu.pipeline_mode<synchronous>, transform_indices = @transform_2, window_bounds = array<i64: 16, 128>}, {pipeline_mode = #tpu.pipeline_mode<synchronous>, transform_indices = @transform_3, window_bounds = array<i64: 16, 8>}]} {
    %c0 = arith.constant 0 : index
    %c0_0 = arith.constant 0 : index
    %0 = vector.load %arg1[%c0, %c0_0] : memref<16x16xf32, #tpu.memory_space<vmem>>, vector<16x16xf32>
    %c0_1 = arith.constant 0 : index
    %c0_2 = arith.constant 0 : index
    %1 = vector.load %arg2[%c0_1, %c0_2] : memref<192x128xf32, #tpu.memory_space<vmem>>, vector<16x32xf32>
    %cst = arith.constant dense<0.000000e+00> : vector<16x32xf32>
    %2 = tpu.matmul %0, %1, %cst {dimension_numbers = #tpu.dot_dimension_numbers<[1], [0], [0], [1], [0, 0, 1, 1], [], []>} : vector<16x16xf32>, vector<16x32xf32>, vector<16x32xf32> -> vector<16x32xf32>
    %c0_3 = arith.constant 0 : index
    %c0_4 = arith.constant 0 : index
    %3 = vector.load %arg3[%c0_3, %c0_4] : memref<16x128xf32, #tpu.memory_space<vmem>>, vector<1x32xf32>
    %4 = vector.broadcast %3 : vector<1x32xf32> to vector<16x32xf32>
    %5 = arith.addf %2, %4 : vector<16x32xf32>
    %cst_5 = arith.constant 0.000000e+00 : f32
    %6 = vector.broadcast %cst_5 : f32 to vector<16x32xf32>
    %7 = arith.cmpf ogt, %5, %6 : vector<16x32xf32>
    %cst_6 = arith.constant 0.000000e+00 : f32
    %8 = vector.broadcast %cst_6 : f32 to vector<16x32xf32>
    %9 = arith.minimumf %5, %8 : vector<16x32xf32>
    %10 = math.exp %9 : vector<16x32xf32>
    %cst_7 = arith.constant 1.000000e+00 : f32
    %11 = vector.broadcast %cst_7 : f32 to vector<16x32xf32>
    %12 = arith.subf %10, %11 : vector<16x32xf32>
    %13 = arith.select %7, %5, %12 : vector<16x32xi1>, vector<16x32xf32>
    %c16 = arith.constant 16 : index
    %c0_8 = arith.constant 0 : index
    %14 = vector.load %arg2[%c16, %c0_8] : memref<192x128xf32, #tpu.memory_space<vmem>>, vector<32x128xf32>
    %cst_9 = arith.constant dense<0.000000e+00> : vector<16x128xf32>
    %15 = tpu.matmul %13, %14, %cst_9 {dimension_numbers = #tpu.dot_dimension_numbers<[1], [0], [0], [1], [0, 0, 1, 1], [], []>} : vector<16x32xf32>, vector<32x128xf32>, vector<16x128xf32> -> vector<16x128xf32>
    %c1 = arith.constant 1 : index
    %c0_10 = arith.constant 0 : index
    %16 = vector.load %arg3[%c1, %c0_10] : memref<16x128xf32, #tpu.memory_space<vmem>>, vector<1x128xf32>
    %17 = vector.broadcast %16 : vector<1x128xf32> to vector<16x128xf32>
    %18 = arith.addf %15, %17 : vector<16x128xf32>
    %19 = vector.extract_strided_slice %18 {offsets = [0, 0], sizes = [16, 64], strides = [1, 1]} : vector<16x128xf32> to vector<16x64xf32>
    %20 = vector.extract_strided_slice %18 {offsets = [0, 64], sizes = [16, 64], strides = [1, 1]} : vector<16x128xf32> to vector<16x64xf32>
    %21 = tpu.iota {dimensions = array<i32: 0>} : vector<8x64xi32>
    %c2 = arith.constant 2 : index
    %c0_11 = arith.constant 0 : index
    %22 = vector.load %arg3[%c2, %c0_11] : memref<16x128xf32, #tpu.memory_space<vmem>>, vector<1x64xf32>
    %23 = vector.extract_strided_slice %19 {offsets = [0, 0], sizes = [8, 64], strides = [1, 1]} : vector<16x64xf32> to vector<8x64xf32>
    %cst_12 = arith.constant 0.000000e+00 : f32
    %24 = vector.broadcast %cst_12 : f32 to vector<8x64xf32>
    %25 = vector.broadcast %22 : vector<1x64xf32> to vector<8x64xf32>
    %26 = arith.addf %24, %25 : vector<8x64xf32>
    %c6 = arith.constant 6 : index
    %c0_13 = arith.constant 0 : index
    %27 = vector.load %arg3[%c6, %c0_13] : memref<16x128xf32, #tpu.memory_space<vmem>>, vector<1x64xf32>
    %c3_i32 = arith.constant 3 : i32
    %28 = tpu.dynamic_rotate %23 by %c3_i32 dim 0 : vector<8x64xf32>, i32 -> vector<8x64xf32>
    %c3_i32_14 = arith.constant 3 : i32
    %29 = vector.broadcast %c3_i32_14 : i32 to vector<8x64xi32>
    %30 = arith.cmpi sge, %21, %29 : vector<8x64xi32>
    %cst_15 = arith.constant 0.000000e+00 : f32
    %31 = vector.broadcast %cst_15 : f32 to vector<8x64xf32>
    %32 = arith.select %30, %28, %31 : vector<8x64xi1>, vector<8x64xf32>
    %33 = vector.broadcast %27 : vector<1x64xf32> to vector<8x64xf32>
    %34 = arith.mulf %32, %33 : vector<8x64xf32>
    %35 = arith.addf %26, %34 : vector<8x64xf32>
    %c7 = arith.constant 7 : index
    %c0_16 = arith.constant 0 : index
    %36 = vector.load %arg3[%c7, %c0_16] : memref<16x128xf32, #tpu.memory_space<vmem>>, vector<1x64xf32>
    %c2_i32 = arith.constant 2 : i32
    %37 = tpu.dynamic_rotate %23 by %c2_i32 dim 0 : vector<8x64xf32>, i32 -> vector<8x64xf32>
    %c2_i32_17 = arith.constant 2 : i32
    %38 = vector.broadcast %c2_i32_17 : i32 to vector<8x64xi32>
    %39 = arith.cmpi sge, %21, %38 : vector<8x64xi32>
    %cst_18 = arith.constant 0.000000e+00 : f32
    %40 = vector.broadcast %cst_18 : f32 to vector<8x64xf32>
    %41 = arith.select %39, %37, %40 : vector<8x64xi1>, vector<8x64xf32>
    %42 = vector.broadcast %36 : vector<1x64xf32> to vector<8x64xf32>
    %43 = arith.mulf %41, %42 : vector<8x64xf32>
    %44 = arith.addf %35, %43 : vector<8x64xf32>
    %c8 = arith.constant 8 : index
    %c0_19 = arith.constant 0 : index
    %45 = vector.load %arg3[%c8, %c0_19] : memref<16x128xf32, #tpu.memory_space<vmem>>, vector<1x64xf32>
    %c1_i32 = arith.constant 1 : i32
    %46 = tpu.dynamic_rotate %23 by %c1_i32 dim 0 : vector<8x64xf32>, i32 -> vector<8x64xf32>
    %c1_i32_20 = arith.constant 1 : i32
    %47 = vector.broadcast %c1_i32_20 : i32 to vector<8x64xi32>
    %48 = arith.cmpi sge, %21, %47 : vector<8x64xi32>
    %cst_21 = arith.constant 0.000000e+00 : f32
    %49 = vector.broadcast %cst_21 : f32 to vector<8x64xf32>
    %50 = arith.select %48, %46, %49 : vector<8x64xi1>, vector<8x64xf32>
    %51 = vector.broadcast %45 : vector<1x64xf32> to vector<8x64xf32>
    %52 = arith.mulf %50, %51 : vector<8x64xf32>
    %53 = arith.addf %44, %52 : vector<8x64xf32>
    %c9 = arith.constant 9 : index
    %c0_22 = arith.constant 0 : index
    %54 = vector.load %arg3[%c9, %c0_22] : memref<16x128xf32, #tpu.memory_space<vmem>>, vector<1x64xf32>
    %55 = vector.broadcast %54 : vector<1x64xf32> to vector<8x64xf32>
    %56 = arith.mulf %23, %55 : vector<8x64xf32>
    %57 = arith.addf %53, %56 : vector<8x64xf32>
    %58 = vector.extract_strided_slice %19 {offsets = [8, 0], sizes = [8, 64], strides = [1, 1]} : vector<16x64xf32> to vector<8x64xf32>
    %cst_23 = arith.constant 0.000000e+00 : f32
    %59 = vector.broadcast %cst_23 : f32 to vector<8x64xf32>
    %60 = vector.broadcast %22 : vector<1x64xf32> to vector<8x64xf32>
    %61 = arith.addf %59, %60 : vector<8x64xf32>
    %c6_24 = arith.constant 6 : index
    %c0_25 = arith.constant 0 : index
    %62 = vector.load %arg3[%c6_24, %c0_25] : memref<16x128xf32, #tpu.memory_space<vmem>>, vector<1x64xf32>
    %c3_i32_26 = arith.constant 3 : i32
    %63 = tpu.dynamic_rotate %58 by %c3_i32_26 dim 0 : vector<8x64xf32>, i32 -> vector<8x64xf32>
    %c3_i32_27 = arith.constant 3 : i32
    %64 = vector.broadcast %c3_i32_27 : i32 to vector<8x64xi32>
    %65 = arith.cmpi sge, %21, %64 : vector<8x64xi32>
    %cst_28 = arith.constant 0.000000e+00 : f32
    %66 = vector.broadcast %cst_28 : f32 to vector<8x64xf32>
    %67 = arith.select %65, %63, %66 : vector<8x64xi1>, vector<8x64xf32>
    %68 = vector.broadcast %62 : vector<1x64xf32> to vector<8x64xf32>
    %69 = arith.mulf %67, %68 : vector<8x64xf32>
    %70 = arith.addf %61, %69 : vector<8x64xf32>
    %c7_29 = arith.constant 7 : index
    %c0_30 = arith.constant 0 : index
    %71 = vector.load %arg3[%c7_29, %c0_30] : memref<16x128xf32, #tpu.memory_space<vmem>>, vector<1x64xf32>
    %c2_i32_31 = arith.constant 2 : i32
    %72 = tpu.dynamic_rotate %58 by %c2_i32_31 dim 0 : vector<8x64xf32>, i32 -> vector<8x64xf32>
    %c2_i32_32 = arith.constant 2 : i32
    %73 = vector.broadcast %c2_i32_32 : i32 to vector<8x64xi32>
    %74 = arith.cmpi sge, %21, %73 : vector<8x64xi32>
    %cst_33 = arith.constant 0.000000e+00 : f32
    %75 = vector.broadcast %cst_33 : f32 to vector<8x64xf32>
    %76 = arith.select %74, %72, %75 : vector<8x64xi1>, vector<8x64xf32>
    %77 = vector.broadcast %71 : vector<1x64xf32> to vector<8x64xf32>
    %78 = arith.mulf %76, %77 : vector<8x64xf32>
    %79 = arith.addf %70, %78 : vector<8x64xf32>
    %c8_34 = arith.constant 8 : index
    %c0_35 = arith.constant 0 : index
    %80 = vector.load %arg3[%c8_34, %c0_35] : memref<16x128xf32, #tpu.memory_space<vmem>>, vector<1x64xf32>
    %c1_i32_36 = arith.constant 1 : i32
    %81 = tpu.dynamic_rotate %58 by %c1_i32_36 dim 0 : vector<8x64xf32>, i32 -> vector<8x64xf32>
    %c1_i32_37 = arith.constant 1 : i32
    %82 = vector.broadcast %c1_i32_37 : i32 to vector<8x64xi32>
    %83 = arith.cmpi sge, %21, %82 : vector<8x64xi32>
    %cst_38 = arith.constant 0.000000e+00 : f32
    %84 = vector.broadcast %cst_38 : f32 to vector<8x64xf32>
    %85 = arith.select %83, %81, %84 : vector<8x64xi1>, vector<8x64xf32>
    %86 = vector.broadcast %80 : vector<1x64xf32> to vector<8x64xf32>
    %87 = arith.mulf %85, %86 : vector<8x64xf32>
    %88 = arith.addf %79, %87 : vector<8x64xf32>
    %c9_39 = arith.constant 9 : index
    %c0_40 = arith.constant 0 : index
    %89 = vector.load %arg3[%c9_39, %c0_40] : memref<16x128xf32, #tpu.memory_space<vmem>>, vector<1x64xf32>
    %90 = vector.broadcast %89 : vector<1x64xf32> to vector<8x64xf32>
    %91 = arith.mulf %58, %90 : vector<8x64xf32>
    %92 = arith.addf %88, %91 : vector<8x64xf32>
    %93 = tpu.concatenate %57, %92 in 0 : vector<8x64xf32>, vector<8x64xf32> -> vector<16x64xf32>
    %cst_41 = arith.constant 5.000000e-01 : f32
    %94 = vector.broadcast %cst_41 : f32 to vector<16x64xf32>
    %95 = arith.mulf %94, %93 : vector<16x64xf32>
    %96 = math.tanh %95 : vector<16x64xf32>
    %cst_42 = arith.constant 1.000000e+00 : f32
    %97 = vector.broadcast %cst_42 : f32 to vector<16x64xf32>
    %98 = arith.addf %96, %97 : vector<16x64xf32>
    %cst_43 = arith.constant 5.000000e-01 : f32
    %99 = vector.broadcast %cst_43 : f32 to vector<16x64xf32>
    %100 = arith.mulf %99, %98 : vector<16x64xf32>
    %101 = arith.mulf %93, %100 : vector<16x64xf32>
    %c48 = arith.constant 48 : index
    %c0_44 = arith.constant 0 : index
    %102 = vector.load %arg2[%c48, %c0_44] : memref<192x128xf32, #tpu.memory_space<vmem>>, vector<64x96xf32>
    %cst_45 = arith.constant dense<0.000000e+00> : vector<16x96xf32>
    %103 = tpu.matmul %101, %102, %cst_45 {dimension_numbers = #tpu.dot_dimension_numbers<[1], [0], [0], [1], [0, 0, 1, 1], [], []>} : vector<16x64xf32>, vector<64x96xf32>, vector<16x96xf32> -> vector<16x96xf32>
    %104 = vector.extract_strided_slice %103 {offsets = [0, 0], sizes = [16, 64], strides = [1, 1]} : vector<16x96xf32> to vector<16x64xf32>
    %c3 = arith.constant 3 : index
    %c0_46 = arith.constant 0 : index
    %105 = vector.load %arg3[%c3, %c0_46] : memref<16x128xf32, #tpu.memory_space<vmem>>, vector<1x64xf32>
    %106 = vector.broadcast %105 : vector<1x64xf32> to vector<16x64xf32>
    %107 = arith.addf %104, %106 : vector<16x64xf32>
    %cst_47 = arith.constant 0.000000e+00 : f32
    %108 = vector.broadcast %cst_47 : f32 to vector<16x64xf32>
    %109 = arith.maximumf %107, %108 : vector<16x64xf32>
    %110 = math.absf %107 : vector<16x64xf32>
    %cst_48 = arith.constant 0.000000e+00 : f32
    %111 = vector.broadcast %cst_48 : f32 to vector<16x64xf32>
    %112 = arith.subf %111, %110 : vector<16x64xf32>
    %113 = math.exp %112 : vector<16x64xf32>
    %cst_49 = arith.constant 1.000000e+00 : f32
    %114 = vector.broadcast %cst_49 : f32 to vector<16x64xf32>
    %115 = arith.addf %114, %113 : vector<16x64xf32>
    %116 = math.log %115 : vector<16x64xf32>
    %117 = arith.addf %109, %116 : vector<16x64xf32>
    %118 = vector.extract_strided_slice %103 {offsets = [0, 64], sizes = [16, 16], strides = [1, 1]} : vector<16x96xf32> to vector<16x16xf32>
    %119 = vector.extract_strided_slice %103 {offsets = [0, 80], sizes = [16, 16], strides = [1, 1]} : vector<16x96xf32> to vector<16x16xf32>
    %120 = arith.mulf %117, %101 : vector<16x64xf32>
    %c112 = arith.constant 112 : index
    %c0_50 = arith.constant 0 : index
    %121 = vector.load %arg2[%c112, %c0_50] : memref<192x128xf32, #tpu.memory_space<vmem>>, vector<16x64xf32>
    %122 = tpu.concatenate %121, %121, %121, %121, %121, %121, %121, %121 in 0 : vector<16x64xf32>, vector<16x64xf32>, vector<16x64xf32>, vector<16x64xf32>, vector<16x64xf32>, vector<16x64xf32>, vector<16x64xf32>, vector<16x64xf32> -> vector<128x64xf32>
    %123 = tpu.iota {dimensions = array<i32: 1>} : vector<8x128xi32>
    %124 = tpu.iota {dimensions = array<i32: 0>} : vector<8x128xi32>
    %c16_i32 = arith.constant 16 : i32
    %125 = vector.broadcast %c16_i32 : i32 to vector<8x128xi32>
    %126 = arith.muli %124, %125 : vector<8x128xi32>
    %127 = arith.cmpi sge, %123, %126 : vector<8x128xi32>
    %c1_i32_51 = arith.constant 1 : i32
    %128 = vector.broadcast %c1_i32_51 : i32 to vector<8x128xi32>
    %129 = arith.addi %124, %128 : vector<8x128xi32>
    %c16_i32_52 = arith.constant 16 : i32
    %130 = vector.broadcast %c16_i32_52 : i32 to vector<8x128xi32>
    %131 = arith.muli %129, %130 : vector<8x128xi32>
    %132 = arith.cmpi slt, %123, %131 : vector<8x128xi32>
    %133 = arith.andi %127, %132 : vector<8x128xi1>
    %cst_53 = arith.constant 1.000000e+00 : f32
    %cst_54 = arith.constant 0.000000e+00 : f32
    %134 = vector.broadcast %cst_53 : f32 to vector<8x128xf32>
    %135 = vector.broadcast %cst_54 : f32 to vector<8x128xf32>
    %136 = arith.select %133, %134, %135 : vector<8x128xi1>, vector<8x128xf32>
    %137 = tpu.iota {dimensions = array<i32: 0>} : vector<128x8xi32>
    %138 = tpu.iota {dimensions = array<i32: 1>} : vector<128x8xi32>
    %c16_i32_55 = arith.constant 16 : i32
    %139 = vector.broadcast %c16_i32_55 : i32 to vector<128x8xi32>
    %140 = arith.muli %138, %139 : vector<128x8xi32>
    %141 = arith.cmpi sge, %137, %140 : vector<128x8xi32>
    %c1_i32_56 = arith.constant 1 : i32
    %142 = vector.broadcast %c1_i32_56 : i32 to vector<128x8xi32>
    %143 = arith.addi %138, %142 : vector<128x8xi32>
    %c16_i32_57 = arith.constant 16 : i32
    %144 = vector.broadcast %c16_i32_57 : i32 to vector<128x8xi32>
    %145 = arith.muli %143, %144 : vector<128x8xi32>
    %146 = arith.cmpi slt, %137, %145 : vector<128x8xi32>
    %147 = arith.andi %141, %146 : vector<128x8xi1>
    %cst_58 = arith.constant 1.000000e+00 : f32
    %cst_59 = arith.constant 0.000000e+00 : f32
    %148 = vector.broadcast %cst_58 : f32 to vector<128x8xf32>
    %149 = vector.broadcast %cst_59 : f32 to vector<128x8xf32>
    %150 = arith.select %147, %148, %149 : vector<128x8xi1>, vector<128x8xf32>
    %151 = vector.extract_strided_slice %117 {offsets = [0, 0], sizes = [8, 64], strides = [1, 1]} : vector<16x64xf32> to vector<8x64xf32>
    %cst_60 = arith.constant dense<0.000000e+00> : vector<128x64xf32>
    %152 = tpu.matmul %150, %151, %cst_60 {dimension_numbers = #tpu.dot_dimension_numbers<[1], [0], [0], [1], [0, 0, 1, 1], [], []>} : vector<128x8xf32>, vector<8x64xf32>, vector<128x64xf32> -> vector<128x64xf32>
    %153 = arith.mulf %152, %122 : vector<128x64xf32>
    %154 = math.exp %153 : vector<128x64xf32>
    %155 = vector.extract_strided_slice %118 {offsets = [0, 0], sizes = [8, 16], strides = [1, 1]} : vector<16x16xf32> to vector<8x16xf32>
    %156 = tpu.concatenate %155, %155, %155, %155, %155, %155, %155, %155 in 1 : vector<8x16xf32>, vector<8x16xf32>, vector<8x16xf32>, vector<8x16xf32>, vector<8x16xf32>, vector<8x16xf32>, vector<8x16xf32>, vector<8x16xf32> -> vector<8x128xf32>
    %157 = arith.mulf %136, %156 : vector<8x128xf32>
    %158 = vector.extract_strided_slice %120 {offsets = [0, 0], sizes = [8, 64], strides = [1, 1]} : vector<16x64xf32> to vector<8x64xf32>
    %cst_61 = arith.constant dense<0.000000e+00> : vector<128x64xf32>
    %159 = tpu.matmul %157, %158, %cst_61 {dimension_numbers = #tpu.dot_dimension_numbers<[0], [0], [1], [1], [0, 1, 1, 1], [], []>} : vector<8x128xf32>, vector<8x64xf32>, vector<128x64xf32> -> vector<128x64xf32>
    %cst_62 = arith.constant 0.000000e+00 : f32
    %160 = vector.broadcast %cst_62 : f32 to vector<16x64xf32>
    %161 = vector.extract_strided_slice %154 {offsets = [0, 0], sizes = [16, 64], strides = [1, 1]} : vector<128x64xf32> to vector<16x64xf32>
    %162 = arith.mulf %161, %160 : vector<16x64xf32>
    %163 = vector.extract_strided_slice %159 {offsets = [0, 0], sizes = [16, 64], strides = [1, 1]} : vector<128x64xf32> to vector<16x64xf32>
    %164 = arith.addf %162, %163 : vector<16x64xf32>
    %165 = vector.extract_strided_slice %154 {offsets = [16, 0], sizes = [16, 64], strides = [1, 1]} : vector<128x64xf32> to vector<16x64xf32>
    %166 = arith.mulf %165, %164 : vector<16x64xf32>
    %167 = vector.extract_strided_slice %159 {offsets = [16, 0], sizes = [16, 64], strides = [1, 1]} : vector<128x64xf32> to vector<16x64xf32>
    %168 = arith.addf %166, %167 : vector<16x64xf32>
    %169 = vector.extract_strided_slice %154 {offsets = [32, 0], sizes = [16, 64], strides = [1, 1]} : vector<128x64xf32> to vector<16x64xf32>
    %170 = arith.mulf %169, %168 : vector<16x64xf32>
    %171 = vector.extract_strided_slice %159 {offsets = [32, 0], sizes = [16, 64], strides = [1, 1]} : vector<128x64xf32> to vector<16x64xf32>
    %172 = arith.addf %170, %171 : vector<16x64xf32>
    %173 = vector.extract_strided_slice %154 {offsets = [48, 0], sizes = [16, 64], strides = [1, 1]} : vector<128x64xf32> to vector<16x64xf32>
    %174 = arith.mulf %173, %172 : vector<16x64xf32>
    %175 = vector.extract_strided_slice %159 {offsets = [48, 0], sizes = [16, 64], strides = [1, 1]} : vector<128x64xf32> to vector<16x64xf32>
    %176 = arith.addf %174, %175 : vector<16x64xf32>
    %177 = vector.extract_strided_slice %154 {offsets = [64, 0], sizes = [16, 64], strides = [1, 1]} : vector<128x64xf32> to vector<16x64xf32>
    %178 = arith.mulf %177, %176 : vector<16x64xf32>
    %179 = vector.extract_strided_slice %159 {offsets = [64, 0], sizes = [16, 64], strides = [1, 1]} : vector<128x64xf32> to vector<16x64xf32>
    %180 = arith.addf %178, %179 : vector<16x64xf32>
    %181 = vector.extract_strided_slice %154 {offsets = [80, 0], sizes = [16, 64], strides = [1, 1]} : vector<128x64xf32> to vector<16x64xf32>
    %182 = arith.mulf %181, %180 : vector<16x64xf32>
    %183 = vector.extract_strided_slice %159 {offsets = [80, 0], sizes = [16, 64], strides = [1, 1]} : vector<128x64xf32> to vector<16x64xf32>
    %184 = arith.addf %182, %183 : vector<16x64xf32>
    %185 = vector.extract_strided_slice %154 {offsets = [96, 0], sizes = [16, 64], strides = [1, 1]} : vector<128x64xf32> to vector<16x64xf32>
    %186 = arith.mulf %185, %184 : vector<16x64xf32>
    %187 = vector.extract_strided_slice %159 {offsets = [96, 0], sizes = [16, 64], strides = [1, 1]} : vector<128x64xf32> to vector<16x64xf32>
    %188 = arith.addf %186, %187 : vector<16x64xf32>
    %189 = vector.extract_strided_slice %154 {offsets = [112, 0], sizes = [16, 64], strides = [1, 1]} : vector<128x64xf32> to vector<16x64xf32>
    %190 = arith.mulf %189, %188 : vector<16x64xf32>
    %191 = vector.extract_strided_slice %159 {offsets = [112, 0], sizes = [16, 64], strides = [1, 1]} : vector<128x64xf32> to vector<16x64xf32>
    %192 = arith.addf %190, %191 : vector<16x64xf32>
    %193 = tpu.concatenate %164, %168, %172, %176, %180, %184, %188, %192 in 0 : vector<16x64xf32>, vector<16x64xf32>, vector<16x64xf32>, vector<16x64xf32>, vector<16x64xf32>, vector<16x64xf32>, vector<16x64xf32>, vector<16x64xf32> -> vector<128x64xf32>
    %194 = vector.extract_strided_slice %119 {offsets = [0, 0], sizes = [8, 16], strides = [1, 1]} : vector<16x16xf32> to vector<8x16xf32>
    %195 = tpu.concatenate %194, %194, %194, %194, %194, %194, %194, %194 in 1 : vector<8x16xf32>, vector<8x16xf32>, vector<8x16xf32>, vector<8x16xf32>, vector<8x16xf32>, vector<8x16xf32>, vector<8x16xf32>, vector<8x16xf32> -> vector<8x128xf32>
    %196 = arith.mulf %136, %195 : vector<8x128xf32>
    %cst_63 = arith.constant dense<0.000000e+00> : vector<8x64xf32>
    %197 = tpu.matmul %196, %193, %cst_63 {dimension_numbers = #tpu.dot_dimension_numbers<[1], [0], [0], [1], [0, 0, 1, 1], [], []>} : vector<8x128xf32>, vector<128x64xf32>, vector<8x64xf32> -> vector<8x64xf32>
    %198 = vector.extract_strided_slice %117 {offsets = [8, 0], sizes = [8, 64], strides = [1, 1]} : vector<16x64xf32> to vector<8x64xf32>
    %cst_64 = arith.constant dense<0.000000e+00> : vector<128x64xf32>
    %199 = tpu.matmul %150, %198, %cst_64 {dimension_numbers = #tpu.dot_dimension_numbers<[1], [0], [0], [1], [0, 0, 1, 1], [], []>} : vector<128x8xf32>, vector<8x64xf32>, vector<128x64xf32> -> vector<128x64xf32>
    %200 = arith.mulf %199, %122 : vector<128x64xf32>
    %201 = math.exp %200 : vector<128x64xf32>
    %202 = vector.extract_strided_slice %118 {offsets = [8, 0], sizes = [8, 16], strides = [1, 1]} : vector<16x16xf32> to vector<8x16xf32>
    %203 = tpu.concatenate %202, %202, %202, %202, %202, %202, %202, %202 in 1 : vector<8x16xf32>, vector<8x16xf32>, vector<8x16xf32>, vector<8x16xf32>, vector<8x16xf32>, vector<8x16xf32>, vector<8x16xf32>, vector<8x16xf32> -> vector<8x128xf32>
    %204 = arith.mulf %136, %203 : vector<8x128xf32>
    %205 = vector.extract_strided_slice %120 {offsets = [8, 0], sizes = [8, 64], strides = [1, 1]} : vector<16x64xf32> to vector<8x64xf32>
    %cst_65 = arith.constant dense<0.000000e+00> : vector<128x64xf32>
    %206 = tpu.matmul %204, %205, %cst_65 {dimension_numbers = #tpu.dot_dimension_numbers<[0], [0], [1], [1], [0, 1, 1, 1], [], []>} : vector<8x128xf32>, vector<8x64xf32>, vector<128x64xf32> -> vector<128x64xf32>
    %cst_66 = arith.constant 0.000000e+00 : f32
    %207 = vector.broadcast %cst_66 : f32 to vector<16x64xf32>
    %208 = vector.extract_strided_slice %201 {offsets = [0, 0], sizes = [16, 64], strides = [1, 1]} : vector<128x64xf32> to vector<16x64xf32>
    %209 = arith.mulf %208, %207 : vector<16x64xf32>
    %210 = vector.extract_strided_slice %206 {offsets = [0, 0], sizes = [16, 64], strides = [1, 1]} : vector<128x64xf32> to vector<16x64xf32>
    %211 = arith.addf %209, %210 : vector<16x64xf32>
    %212 = vector.extract_strided_slice %201 {offsets = [16, 0], sizes = [16, 64], strides = [1, 1]} : vector<128x64xf32> to vector<16x64xf32>
    %213 = arith.mulf %212, %211 : vector<16x64xf32>
    %214 = vector.extract_strided_slice %206 {offsets = [16, 0], sizes = [16, 64], strides = [1, 1]} : vector<128x64xf32> to vector<16x64xf32>
    %215 = arith.addf %213, %214 : vector<16x64xf32>
    %216 = vector.extract_strided_slice %201 {offsets = [32, 0], sizes = [16, 64], strides = [1, 1]} : vector<128x64xf32> to vector<16x64xf32>
    %217 = arith.mulf %216, %215 : vector<16x64xf32>
    %218 = vector.extract_strided_slice %206 {offsets = [32, 0], sizes = [16, 64], strides = [1, 1]} : vector<128x64xf32> to vector<16x64xf32>
    %219 = arith.addf %217, %218 : vector<16x64xf32>
    %220 = vector.extract_strided_slice %201 {offsets = [48, 0], sizes = [16, 64], strides = [1, 1]} : vector<128x64xf32> to vector<16x64xf32>
    %221 = arith.mulf %220, %219 : vector<16x64xf32>
    %222 = vector.extract_strided_slice %206 {offsets = [48, 0], sizes = [16, 64], strides = [1, 1]} : vector<128x64xf32> to vector<16x64xf32>
    %223 = arith.addf %221, %222 : vector<16x64xf32>
    %224 = vector.extract_strided_slice %201 {offsets = [64, 0], sizes = [16, 64], strides = [1, 1]} : vector<128x64xf32> to vector<16x64xf32>
    %225 = arith.mulf %224, %223 : vector<16x64xf32>
    %226 = vector.extract_strided_slice %206 {offsets = [64, 0], sizes = [16, 64], strides = [1, 1]} : vector<128x64xf32> to vector<16x64xf32>
    %227 = arith.addf %225, %226 : vector<16x64xf32>
    %228 = vector.extract_strided_slice %201 {offsets = [80, 0], sizes = [16, 64], strides = [1, 1]} : vector<128x64xf32> to vector<16x64xf32>
    %229 = arith.mulf %228, %227 : vector<16x64xf32>
    %230 = vector.extract_strided_slice %206 {offsets = [80, 0], sizes = [16, 64], strides = [1, 1]} : vector<128x64xf32> to vector<16x64xf32>
    %231 = arith.addf %229, %230 : vector<16x64xf32>
    %232 = vector.extract_strided_slice %201 {offsets = [96, 0], sizes = [16, 64], strides = [1, 1]} : vector<128x64xf32> to vector<16x64xf32>
    %233 = arith.mulf %232, %231 : vector<16x64xf32>
    %234 = vector.extract_strided_slice %206 {offsets = [96, 0], sizes = [16, 64], strides = [1, 1]} : vector<128x64xf32> to vector<16x64xf32>
    %235 = arith.addf %233, %234 : vector<16x64xf32>
    %236 = vector.extract_strided_slice %201 {offsets = [112, 0], sizes = [16, 64], strides = [1, 1]} : vector<128x64xf32> to vector<16x64xf32>
    %237 = arith.mulf %236, %235 : vector<16x64xf32>
    %238 = vector.extract_strided_slice %206 {offsets = [112, 0], sizes = [16, 64], strides = [1, 1]} : vector<128x64xf32> to vector<16x64xf32>
    %239 = arith.addf %237, %238 : vector<16x64xf32>
    %240 = tpu.concatenate %211, %215, %219, %223, %227, %231, %235, %239 in 0 : vector<16x64xf32>, vector<16x64xf32>, vector<16x64xf32>, vector<16x64xf32>, vector<16x64xf32>, vector<16x64xf32>, vector<16x64xf32>, vector<16x64xf32> -> vector<128x64xf32>
    %241 = vector.extract_strided_slice %119 {offsets = [8, 0], sizes = [8, 16], strides = [1, 1]} : vector<16x16xf32> to vector<8x16xf32>
    %242 = tpu.concatenate %241, %241, %241, %241, %241, %241, %241, %241 in 1 : vector<8x16xf32>, vector<8x16xf32>, vector<8x16xf32>, vector<8x16xf32>, vector<8x16xf32>, vector<8x16xf32>, vector<8x16xf32>, vector<8x16xf32> -> vector<8x128xf32>
    %243 = arith.mulf %136, %242 : vector<8x128xf32>
    %cst_67 = arith.constant dense<0.000000e+00> : vector<8x64xf32>
    %244 = tpu.matmul %243, %240, %cst_67 {dimension_numbers = #tpu.dot_dimension_numbers<[1], [0], [0], [1], [0, 0, 1, 1], [], []>} : vector<8x128xf32>, vector<128x64xf32>, vector<8x64xf32> -> vector<8x64xf32>
    %245 = tpu.concatenate %197, %244 in 0 : vector<8x64xf32>, vector<8x64xf32> -> vector<16x64xf32>
    %c4 = arith.constant 4 : index
    %c0_68 = arith.constant 0 : index
    %246 = vector.load %arg3[%c4, %c0_68] : memref<16x128xf32, #tpu.memory_space<vmem>>, vector<1x64xf32>
    %247 = vector.broadcast %246 : vector<1x64xf32> to vector<16x64xf32>
    %248 = arith.mulf %101, %247 : vector<16x64xf32>
    %249 = arith.addf %245, %248 : vector<16x64xf32>
    %cst_69 = arith.constant 5.000000e-01 : f32
    %250 = vector.broadcast %cst_69 : f32 to vector<16x64xf32>
    %251 = arith.mulf %250, %20 : vector<16x64xf32>
    %252 = math.tanh %251 : vector<16x64xf32>
    %cst_70 = arith.constant 1.000000e+00 : f32
    %253 = vector.broadcast %cst_70 : f32 to vector<16x64xf32>
    %254 = arith.addf %252, %253 : vector<16x64xf32>
    %cst_71 = arith.constant 5.000000e-01 : f32
    %255 = vector.broadcast %cst_71 : f32 to vector<16x64xf32>
    %256 = arith.mulf %255, %254 : vector<16x64xf32>
    %257 = arith.mulf %20, %256 : vector<16x64xf32>
    %258 = arith.mulf %249, %257 : vector<16x64xf32>
    %c128 = arith.constant 128 : index
    %c0_72 = arith.constant 0 : index
    %259 = vector.load %arg2[%c128, %c0_72] : memref<192x128xf32, #tpu.memory_space<vmem>>, vector<64x8xf32>
    %cst_73 = arith.constant dense<0.000000e+00> : vector<16x8xf32>
    %260 = tpu.matmul %258, %259, %cst_73 {dimension_numbers = #tpu.dot_dimension_numbers<[1], [0], [0], [1], [0, 0, 1, 1], [], []>} : vector<16x64xf32>, vector<64x8xf32>, vector<16x8xf32> -> vector<16x8xf32>
    %c5 = arith.constant 5 : index
    %c0_74 = arith.constant 0 : index
    %261 = vector.load %arg3[%c5, %c0_74] : memref<16x128xf32, #tpu.memory_space<vmem>>, vector<1x8xf32>
    %262 = vector.broadcast %261 : vector<1x8xf32> to vector<16x8xf32>
    %263 = arith.addf %260, %262 : vector<16x8xf32>
    %c0_75 = arith.constant 0 : index
    %c0_76 = arith.constant 0 : index
    %264 = vector.load %arg4[%c0_75, %c0_76] : memref<16x8xf32, #tpu.memory_space<vmem>>, vector<16x8xf32>
    tpu.vector_store %arg4[%c0_75, %c0_76], %263 {strides = array<i32>} : memref<16x8xf32, #tpu.memory_space<vmem>>, vector<16x8xf32>,
    return
  }
  func.func @transform_0(%arg0: i32) -> (i32, i32) {
    %c0_i32 = arith.constant 0 : i32
    %c0_i32_0 = arith.constant 0 : i32
    %c0_i32_1 = arith.constant 0 : i32
    return %c0_i32, %c0_i32_0 : i32, i32
  }
  func.func @transform_1(%arg0: i32) -> (i32, i32) {
    %c0_i32 = arith.constant 0 : i32
    %c0_i32_0 = arith.constant 0 : i32
    %c0_i32_1 = arith.constant 0 : i32
    return %c0_i32, %c0_i32_0 : i32, i32
  }
  func.func @transform_2(%arg0: i32) -> (i32, i32) {
    %c0_i32 = arith.constant 0 : i32
    %c0_i32_0 = arith.constant 0 : i32
    %c0_i32_1 = arith.constant 0 : i32
    return %c0_i32, %c0_i32_0 : i32, i32
  }
  func.func @transform_3(%arg0: i32) -> (i32, i32) {
    %c0_i32 = arith.constant 0 : i32
    %c0_i32_0 = arith.constant 0 : i32
    %c0_i32_1 = arith.constant 0 : i32
    return %c0_i32, %c0_i32_0 : i32, i32
  }
}

</mosaic_0001>

<bundles_post_ra>
// kernel: tpu_custom_call.1
= control target key start
LH: loop header
LB: loop body
LE: loop exit
PB: predicated region body
PF: predicated region fallthrough
CT: control target
= control target key end

     0   :  { %8 = vsyncpa [#allocation3], 0  ;;  %s3076_s0 = inlined_call_operand.hbm [shape: f32[16,16], index: 0, kind: input, shape index: {}]   ;;  %s3077_s1 = inlined_call_operand.hbm [shape: f32[192,128], index: 1, kind: input, shape index: {}]   ;;  %s3078_s2 = inlined_call_operand.hbm [shape: f32[16,128], index: 2, kind: input, shape index: {}]   ;;  %s3079_s3 = inlined_call_operand.vmem [shape: f32[16,8], index: 3, kind: output, shape index: {}]  }
   0x1   :  { %9 = vsyncpa [#allocation5], 0  ;;  %s2535_s12 = smov [#allocation4]   ;;  %s2536_s14 = smov [#allocation2]  }
   0x2   :  { %s27_s13 = sshll.u32 %s2535_s12, 4  ;;  %s15_s15 = sshll.u32 %s2536_s14, 4  ;;  %s28_s13 = int_to_ptr.vmem [resolvable:$true] %s27_s13  ;;  %s2570_s15 = int_to_ptr.vmem [resolvable:$true] %s15_s15 }
   0x3   :  { %s2465_s18 = scalar_lea.hbm %s3077_s1, 3072 }
   0x4   :  { %p2466_p0 = scmp.ne.s32.totalorder %s3077_s1, %s2465_s18  ;;  %p2469_p1 = scmp.lt.u32.totalorder %s2465_s18, %s3077_s1 }
   0x6   :  { %p2471_p2 = pnand %p2469_p1, %p2466_p0 }
   0x8   :  { %2474 = shalt.err (!%p2471_p2)
}
   0x9   :  { %s2475_s23 = scalar_lea.vmem %s28_s13, 3072  ;;  %p2480_p4 = scmp.lt.s32.totalorder %s28_s13, %s28_s13 }
   0xa   :  { %p2476_p3 = scmp.ne.s32.totalorder %s28_s13, %s2475_s23  ;;  %p2481_p5 = scmp.lt.s32.totalorder %s2475_s23, %s2475_s23 }
   0xc   :  { %p2482_p6 = por %p2481_p5, %p2480_p4 }
   0xe   :  { %p2483_p7 = pnand %p2482_p6, %p2476_p3 }
  0x10   :  { %2486 = shalt.err (!%p2483_p7)
}
  0x11   :  { %s2537_s24 = smov 128   ;;  %s2538_s25 = smov 8  }
  0x12   :  { %33 = dma.hbm_to_vmem [thread:$0]  %s3077_s1, 3072, %s28_s13, [#allocation5], %s2537_s24, %s2537_s24, %s2538_s25  }
  0x13   :  { %s2487_s30 = scalar_lea.hbm %s3076_s0, 256 }
  0x14   :  { %p2488_p8 = scmp.ne.s32.totalorder %s3076_s0, %s2487_s30  ;;  %p2491_p9 = scmp.lt.u32.totalorder %s2487_s30, %s3076_s0 }
  0x16   :  { %p2493_p10 = pnand %p2491_p9, %p2488_p8 }
  0x18   :  { %2496 = shalt.err (!%p2493_p10)
}
  0x19   :  { %s2497_s8 = scalar_lea.vmem %s2570_s15, 256  ;;  %p2502_p12 = scmp.lt.s32.totalorder %s2570_s15, %s2570_s15 }
  0x1a   :  { %p2498_p11 = scmp.ne.s32.totalorder %s2570_s15, %s2497_s8  ;;  %p2503_p13 = scmp.lt.s32.totalorder %s2497_s8, %s2497_s8 }
  0x1c   :  { %p2504_p0 = por %p2503_p13, %p2502_p12 }
  0x1e   :  { %p2505_p1 = pnand %p2504_p0, %p2498_p11 }
  0x20   :  { %2508 = shalt.err (!%p2505_p1)
}
  0x21   :  { %21 = dma.hbm_to_vmem [thread:$0]  %s3076_s0, 256, %s2570_s15, [#allocation3], %s2537_s24, %s2537_s24, %s2538_s25  }
  0x22   :  { %s2539_s10 = smov [#allocation6]   ;;  %s2509_s14 = scalar_lea.hbm %s3078_s2, 256 }
  0x23   :  { %s39_s11 = sshll.u32 %s2539_s10, 4  ;;  %p2510_p2 = scmp.ne.s32.totalorder %s3078_s2, %s2509_s14  ;;  %s40_s11 = int_to_ptr.vmem [resolvable:$true] %s39_s11 }
  0x24   :  { %p2513_p3 = scmp.lt.u32.totalorder %s2509_s14, %s3078_s2 }
  0x26   :  { %p2515_p4 = pnand %p2513_p3, %p2510_p2 }
  0x28   :  { %2518 = shalt.err (!%p2515_p4)
}
  0x29   :  { %s2519_s20 = scalar_lea.vmem %s40_s11, 256  ;;  %p2524_p6 = scmp.lt.s32.totalorder %s40_s11, %s40_s11 }
  0x2a   :  { %p2520_p5 = scmp.ne.s32.totalorder %s40_s11, %s2519_s20  ;;  %p2525_p7 = scmp.lt.s32.totalorder %s2519_s20, %s2519_s20 }
  0x2c   :  { %p2526_p8 = por %p2525_p7, %p2524_p6 }
  0x2e   :  { %p2527_p9 = pnand %p2526_p8, %p2520_p5 }
  0x30   :  { %2530 = shalt.err (!%p2527_p9)
}
  0x31   :  { %45 = dma.hbm_to_vmem [thread:$0]  %s3078_s2, 256, %s40_s11, [#allocation5], %s2537_s24, %s2537_s24, %s2538_s25  }
  0x32   :  { %2531 = dma.done.wait [#allocation3], 256  }
  0x33   :  { %2532 = vsyncadd [#allocation3], 4294967040 }
  0x34   :  { %2533 = dma.done.wait [#allocation5], 3328  }
  0x35   :  { %2534 = vsyncadd [#allocation5], 4294963968  ;;  %vm64_vm0 = vcmask 130048   ;;  %v57_v0 = vld [vmem:[#allocation4] sm:$0xff]  ;;  %v58_v1 = vld [vmem:[#allocation4 + $0x8] sm:$0xff]  ;;  %vm167_vm1 = vcmask 261120   ;;  %v249_v38 = vlaneseq }
  0x36   :  { %v55_v2 = vld [vmem:[#allocation2] sm:$0xff]  ;;  %v2274_v3 = vpack.c.bf16 %v58_v1, %v57_v0  ;;  %v56_v4 = vld [vmem:[#allocation2 + $0x8] sm:$0xff]  ;;  %v160_v8 = vld [vmem:[#allocation4 + $0x20] sm:$0xff]  ;;  %vm326_vm7 = vcmask 523264   ;;  %s2540_s2 = smov 96   ;;  %s2541_s21 = smov 64  }
  0x37   :  { %2048 = vmatprep.mubr.msk.f32.mxu1 %vm64_vm0, %v55_v2  ;;  %v158_v5 = vld [vmem:[#allocation4 + $0x10] sm:$0xff]  ;;  %v159_v6 = vld [vmem:[#allocation4 + $0x18] sm:$0xff]  ;;  %v161_v9 = vld [vmem:[#allocation4 + $0x28] sm:$0xff]  ;;  %v2627_v40 = vshrl.u32 %v249_v38, 7  ;;  %s2542_s22 = smov 112   ;;  %s2543_s23 = smov 80  }
  0x38   :  { %2275 = vmatprep.subr.bf16.mxu1 %v2274_v3  ;;  %v2278_v7 = vpack.c.bf16 %v159_v6, %v158_v5  ;;  %v2282_v10 = vpack.c.bf16 %v161_v9, %v160_v8  ;;  %v1828_v11 = vld [vmem:[#allocation6] ss:$0 sm:$0xff]  ;;  %v318_v26 = vld [vmem:[#allocation4 + $0x30] sm:$0xff]  ;;  %v319_v27 = vld [vmem:[#allocation4 + $0x38] sm:$0xff]  ;;  %s2544_s24 = smov 32   ;;  %s2545_s25 = smov 16  }
  0x39   :  { %2277 = vmatpush3.bf16.msra.mxu1 %v2274_v3  ;;  %v320_v28 = vld [vmem:[#allocation4 + $0x40] sm:$0xff]  ;;  %v2286_v29 = vpack.c.bf16 %v319_v27, %v318_v26  ;;  %v321_v30 = vld [vmem:[#allocation4 + $0x48] sm:$0xff]  ;;  %v322_v32 = vld [vmem:[#allocation4 + $0x50] sm:$0xff]  ;;  %vm259_vm4 = vcmp.ge.s32.totalorder %v2627_v40, 3  ;;  %vm269_vm5 = vcmp.ge.s32.totalorder %v2627_v40, 2  ;;  %vm279_vm6 = vcmp.ge.s32.totalorder %v2627_v40, 1 }
  0x3a   :  { %2279 = vmatprep.subr.bf16.mxu1 %v2278_v7  ;;  %v2290_v31 = vpack.c.bf16 %v321_v30, %v320_v28  ;;  %v323_v33 = vld [vmem:[#allocation4 + $0x58] sm:$0xff]  ;;  %v324_v35 = vld [vmem:[#allocation4 + $0x60] sm:$0xff]  ;;  %v325_v36 = vld [vmem:[#allocation4 + $0x68] sm:$0xff]  ;;  %s2546_s26 = smov 48   ;;  %vm528_vm10 = vcmask 64512  }
  0x3b   :  { %2287 = vmatprep.subr.bf16.mxu0 %v2286_v29  ;;  %v2294_v34 = vpack.c.bf16 %v323_v33, %v322_v32  ;;  %v2298_v37 = vpack.c.bf16 %v325_v36, %v324_v35  ;;  %v1833_v39 = vld [vmem:[#allocation6 + $0x1] ss:$0 sm:$0xff]  ;;  %v1837_v46 = vld [vmem:[#allocation6 + $0x6] ss:$0 sm:$0xff]  ;;  %v1836_v52 = vld [vmem:[#allocation6 + $0x2] ss:$0 sm:$0xff] }
  0x3c   :  { %2049 = vmatmul.mubr.msk.f32.vlgmr.msra.gmra.mrb[0].mxu1 %vm64_vm0, %v56_v4  ;;  %2289 = vmatpush3.bf16.msra.mxu0 %v2286_v29  ;;  %v1838_v53 = vld [vmem:[#allocation6 + $0x7] ss:$0 sm:$0xff]  ;;  %v1839_v60 = vld [vmem:[#allocation6 + $0x8] ss:$0 sm:$0xff]  ;;  %v1840_v3 = vld [vmem:[#allocation6 + $0x9] ss:$0 sm:$0xff] }
  0x3d   :  { %2281 = vmatpush3.bf16.msra.mxu1 %v2278_v7  ;;  %2291 = vmatprep.subr.bf16.mxu0 %v2290_v31 }
  0x3e   :  { %2283 = vmatprep.subr.bf16.mxu1 %v2282_v10 }
  0x40   :  { %2293 = vmatpush3.bf16.msra.mxu0 %v2290_v31 }
  0x41   :  { %2285 = vmatpush3.bf16.msra.mxu1 %v2282_v10  ;;  %2295 = vmatprep.subr.bf16.mxu0 %v2294_v34 }
  0x44   :  { %2297 = vmatpush3.bf16.msra.mxu0 %v2294_v34 }
  0x45   :  { %2299 = vmatprep.subr.bf16.mxu0 %v2298_v37 }
  0x48   :  { %2301 = vmatpush3.bf16.msra.mxu0 %v2298_v37 }
 0x10f   :  { %v2050_v12 = vpop.f32.mrb[0].mxu1 }
 0x110   :  { %v143_v13 = vadd.f32 %v2050_v12, %v1828_v11  ;;  %v137_v14 = vpop.f32.mrb[1].mxu1 }
 0x111   :  { %v138_v15 = vadd.f32 %v1828_v11, %v137_v14 }
 0x112   :  { %v149_v16 = vmin.f32 %v143_v13, 0.0  ;;  %vm147_vm3 = vcmp.gt.f32.partialorder %v143_v13, 0.0 }
 0x113   :  { %v148_v17 = vmin.f32 %v138_v15, 0.0  ;;  %vm146_vm2 = vcmp.gt.f32.partialorder %v138_v15, 0.0 }
 0x114   :  { %v152_v18 = vmul.f32 1.442695, %v149_v16 }
 0x115   :  { %v150_v19 = vmul.f32 1.442695, %v148_v17 }
 0x116   :  { %2381 = vpow2.f32 %v152_v18 }
 0x117   :  { %2383 = vpow2.f32 %v150_v19 }
 0x120   :  { %v2382_v20 = vpop.eup %2381 }
 0x121   :  { %v2384_v21 = vpop.eup %2383  ;;  %v1832_v22 = vadd.f32 -1.0, %v2382_v20 }
 0x122   :  { %v1831_v23 = vadd.f32 -1.0, %v2384_v21 }
 0x123   :  { %v157_v25 = vsel %vm147_vm3, %v143_v13, %v1832_v22 }
 0x124   :  { %v156_v24 = vsel %vm146_vm2, %v138_v15, %v1831_v23 }
 0x125   :  { %2059 = vmatprep.mubr.msk.f32.mxu1 %vm167_vm1, %v156_v24  ;;  %v1843_v24 = vld [vmem:[#allocation6 + $0x3] ss:$0 sm:$0xff] }
 0x126   :  { %2060 = vmatmul.mubr.msk.f32.vlgmr.msra.gmra.mrb[2].mxu1 %vm167_vm1, %v157_v25 }
 0x1f9   :  { %v2061_v41 = vpop.f32.mrb[2].mxu1 }
 0x1fa   :  { %v2629_v42 = vadd.f32 %v2061_v41, %v1833_v39  ;;  %v240_v43 = vpop.f32.mrb[3].mxu1 }
 0x1fb   :  { %v2631_v44 = vadd.f32 %v1833_v39, %v240_v43 }
 0x1fc   :  { %v294_v45 = vrot.slane %v2629_v42, 5  ;;  %v298_v47 = vrot.slane %v2629_v42, 6  ;;  %v302_v48 = vrot.slane %v2629_v42, 7  ;;  %v306_v8 = vmul.f32 %v1840_v3, %v2629_v42 }
 0x1fd   :  { %v258_v49 = vrot.slane %v2631_v44, 5  ;;  %v268_v50 = vrot.slane %v2631_v44, 6  ;;  %v278_v51 = vrot.slane %v2631_v44, 7  ;;  %v292_v11 = vmul.f32 %v1840_v3, %v2631_v44 }
 0x1fe   :  { %v295_v54 = vsel %vm259_vm4, %v294_v45, 0.0  ;;  %v299_v55 = vsel %vm269_vm5, %v298_v47, 0.0  ;;  %v303_v61 = vsel %vm279_vm6, %v302_v48, 0.0 }
 0x1ff   :  { %v260_v56 = vsel %vm259_vm4, %v258_v49, 0.0  ;;  %v270_v57 = vsel %vm269_vm5, %v268_v50, 0.0  ;;  %v296_v58 = vmul.f32 %v1837_v46, %v295_v54  ;;  %v280_v62 = vsel %vm279_vm6, %v278_v51, 0.0 }
 0x200   :  { %v265_v59 = vmul.f32 %v1837_v46, %v260_v56  ;;  %v300_v0 = vmul.f32 %v1838_v53, %v299_v55  ;;  %v275_v2 = vmul.f32 %v1838_v53, %v270_v57  ;;  %v304_v4 = vmul.f32 %v1839_v60, %v303_v61 }
 0x201   :  { %v297_v63 = vadd.f32 %v1836_v52, %v296_v58  ;;  %v285_v7 = vmul.f32 %v1839_v60, %v280_v62  ;;  %v438_v53 = vand.u32 127, %v249_v38  ;;  %v446_v57 = vadd.s32 8, %v2627_v40 }
 0x202   :  { %v266_v1 = vadd.f32 %v1836_v52, %v265_v59  ;;  %v447_v58 = vadd.s32 16, %v2627_v40  ;;  %v448_v59 = vadd.s32 24, %v2627_v40  ;;  %v449_v38 = vadd.s32 32, %v2627_v40 }
 0x203   :  { %v301_v5 = vadd.f32 %v300_v0, %v297_v63  ;;  %v478_v54 = vadd.s32 1, %v438_v53  ;;  %v2685_v55 = vmul.u32 16, %v438_v53  ;;  %v2547_v60 = vmov 0.0  }
 0x204   :  { %v276_v6 = vadd.f32 %v275_v2, %v266_v1  ;;  %v441_v2 = vadd.s32 1, %v2627_v40 }
 0x205   :  { %v305_v9 = vadd.f32 %v304_v4, %v301_v5  ;;  %v2687_v56 = vmul.u32 16, %v478_v54  ;;  %vm462_vm8 = vcmp.ge.s32.totalorder %v2627_v40, %v2685_v55  ;;  %vm463_vm12 = vcmp.ge.s32.totalorder %v446_v57, %v2685_v55 }
 0x206   :  { %v286_v10 = vadd.f32 %v285_v7, %v276_v6  ;;  %vm464_vm15 = vcmp.ge.s32.totalorder %v447_v58, %v2685_v55  ;;  %vm465_vm3 = vcmp.ge.s32.totalorder %v448_v59, %v2685_v55  ;;  %vm466_vm6 = vcmp.ge.s32.totalorder %v449_v38, %v2685_v55 }
 0x207   :  { %v307_v12 = vadd.f32 %v306_v8, %v305_v9  ;;  %vm480_vm9 = vcmp.lt.s32.totalorder %v2627_v40, %v2687_v56  ;;  %vm481_vm13 = vcmp.lt.s32.totalorder %v446_v57, %v2687_v56  ;;  %vm482_vm2 = vcmp.lt.s32.totalorder %v447_v58, %v2687_v56 }
 0x208   :  { %v293_v13 = vadd.f32 %v292_v11, %v286_v10  ;;  %vm496_vm11 = vmand %vm462_vm8, %vm480_vm9  ;;  %vm483_vm4 = vcmp.lt.s32.totalorder %v448_v59, %v2687_v56  ;;  %vm484_vm8 = vcmp.lt.s32.totalorder %v449_v38, %v2687_v56  ;;  %v439_v5 = vmul.u32 16, %v2627_v40 }
 0x209   :  { %v309_v14 = vmul.f32 0.5, %v307_v12  ;;  %v2698_v61 = vsel %vm496_vm11, 1.0, %v2547_v60  ;;  %vm497_vm14 = vmand %vm463_vm12, %vm481_vm13  ;;  %v442_v6 = vmul.u32 16, %v441_v2  ;;  %vm794_vm12 = vcmask 392192  }
 0x20a   :  { %v308_v15 = vmul.f32 0.5, %v293_v13  ;;  %2083 = vmatprep.mubr.msk.f32.mxu1 %vm528_vm10, %v2698_v61  ;;  %v2709_v62 = vsel %vm497_vm14, 1.0, %v2547_v60  ;;  %vm498_vm5 = vmand %vm464_vm15, %vm482_vm2  ;;  %vm440_vm13 = vcmp.ge.s32.totalorder %v438_v53, %v439_v5  ;;  %vm797_vm15 = vcmask 654336  }
 0x20b   :  { %2385 = vtanh.f32 %v309_v14  ;;  %v2716_v63 = vsel %vm498_vm5, 1.0, %v2547_v60  ;;  %vm499_vm9 = vmand %vm465_vm3, %vm483_vm4  ;;  %vm443_vm14 = vcmp.lt.s32.totalorder %v438_v53, %v442_v6  ;;  %vm799_vm3 = vcmask 785408  }
 0x20c   :  { %2387 = vtanh.f32 %v308_v15  ;;  %v2721_v0 = vsel %vm499_vm9, 1.0, %v2547_v60  ;;  %vm500_vm11 = vmand %vm466_vm6, %vm484_vm8  ;;  %vm801_vm4 = vcmask 916480   ;;  %v455_v59 = vadd.s32 80, %v2627_v40 }
 0x20d   :  { %v2724_v1 = vsel %vm500_vm11, 1.0, %v2547_v60  ;;  %vm444_vm2 = vmand %vm440_vm13, %vm443_vm14  ;;  %v456_v5 = vadd.s32 88, %v2627_v40 }
 0x215   :  { %v2386_v16 = vpop.eup %2385 }
 0x216   :  { %v2388_v17 = vpop.eup %2387  ;;  %v313_v18 = vadd.f32 1.0, %v2386_v16  ;;  %v2739_v16 = vsel %vm444_vm2, 1.0, %v2547_v60 }
 0x217   :  { %v312_v19 = vadd.f32 1.0, %v2388_v17 }
 0x218   :  { %v315_v20 = vmul.f32 0.5, %v313_v18 }
 0x219   :  { %v314_v21 = vmul.f32 0.5, %v312_v19 }
 0x21a   :  { %v2646_v23 = vmul.f32 %v315_v20, %v307_v12 }
 0x21b   :  { %v2644_v22 = vmul.f32 %v314_v21, %v293_v13  ;;  %v450_v21 = vadd.s32 40, %v2627_v40 }
 0x21d   :  { %2078 = vmatprep.mubr.msk.f32.mxu0 %vm326_vm7, %v2644_v22  ;;  %vm467_vm5 = vcmp.ge.s32.totalorder %v450_v21, %v2685_v55  ;;  %vm485_vm6 = vcmp.lt.s32.totalorder %v450_v21, %v2687_v56 }
 0x21e   :  { %2079 = vmatmul.mubr.msk.f32.vlgmr.msra.gmra.mrb[0].mxu0 %vm326_vm7, %v2646_v23  ;;  %vm501_vm8 = vmand %vm467_vm5, %vm485_vm6 }
 0x2f1   :  { %v2652_v25 = vpop.f32.mrb[0].mxu0 }
 0x2f2   :  { %v2654_v26 = vpop.f32.mrb[1].mxu0  ;;  %v414_v27 = vadd.f32 %v2652_v25, %v1843_v24 }
 0x2f3   :  { %777 = vrot.lane.b32.xlu1 %v2654_v26, %s2540_s2  ;;  %771 = vrot.lane.b32.xlu0 %v2654_v26, %s2541_s21  ;;  %v413_v28 = vadd.f32 %v1843_v24, %v2654_v26 }
 0x2f4   :  { %v418_v29 = vand.u32 2147483647, %v414_v27  ;;  %v416_v48 = vmax.f32 %v414_v27, 0.0 }
 0x2f5   :  { %v417_v30 = vand.u32 2147483647, %v413_v28  ;;  %v415_v46 = vmax.f32 %v413_v28, 0.0 }
 0x2f6   :  { %v420_v31 = vsub.f32 0.0, %v418_v29 }
 0x2f7   :  { %780 = vrot.lane.b32.xlu1 %v2654_v26, %s2542_s22  ;;  %774 = vrot.lane.b32.xlu0 %v2654_v26, %s2543_s23  ;;  %v419_v32 = vsub.f32 0.0, %v417_v30 }
 0x2f8   :  { %v423_v33 = vmul.f32 1.442695, %v420_v31 }
 0x2f9   :  { %v421_v34 = vmul.f32 1.442695, %v419_v32  ;;  %v2754_v32 = vsel %vm501_vm8, 1.0, %v2547_v60 }
 0x2fa   :  { %2389 = vpow2.f32 %v423_v33 }
 0x2fb   :  { %786 = vrot.lane.b32.xlu1 %v2654_v26, %s2544_s24  ;;  %783 = vrot.lane.b32.xlu0 %v2654_v26, %s2545_s25  ;;  %2391 = vpow2.f32 %v421_v34 }
 0x2ff   :  { %789 = vrot.lane.b32.xlu0 %v2654_v26, %s2546_s26 }
 0x303   :  { %1333 = vrot.lane.b32.xlu0 %v2652_v25, %s2541_s21 }
 0x304   :  { %v2390_v35 = vpop.eup %2389 }
 0x305   :  { %v2392_v36 = vpop.eup %2391  ;;  %v426_v37 = vadd.f32 1.0, %v2390_v35 }
 0x306   :  { %v425_v39 = vadd.f32 1.0, %v2392_v36 }
 0x307   :  { %1336 = vrot.lane.b32.xlu0 %v2652_v25, %s2543_s23  ;;  %2393 = vlog2.f32 %v426_v37  ;;  %v451_v37 = vadd.s32 48, %v2627_v40 }
 0x308   :  { %2395 = vlog2.f32 %v425_v39 }
 0x309   :  { %vm468_vm9 = vcmp.ge.s32.totalorder %v451_v37, %v2685_v55  ;;  %vm486_vm11 = vcmp.lt.s32.totalorder %v451_v37, %v2687_v56 }
 0x30a   :  { %vm502_vm13 = vmand %vm468_vm9, %vm486_vm11 }
 0x30b   :  { %1339 = vrot.lane.b32.xlu0 %v2652_v25, %s2540_s2 }
 0x30f   :  { %1342 = vrot.lane.b32.xlu0 %v2652_v25, %s2542_s22 }
 0x311   :  { %v2394_v41 = vpop.eup %2393 }
 0x312   :  { %v2396_v43 = vpop.eup %2395  ;;  %v430_v45 = vmul.f32 0.6931472, %v2394_v41  ;;  %v2768_v41 = vsel %vm502_vm13, 1.0, %v2547_v60 }
 0x313   :  { %1345 = vrot.lane.b32.xlu0 %v2652_v25, %s2545_s25  ;;  %v428_v47 = vmul.f32 0.6931472, %v2396_v43 }
 0x314   :  { %v2674_v50 = vadd.f32 %v430_v45, %v416_v48  ;;  %v454_v48 = vadd.s32 72, %v2627_v40 }
 0x315   :  { %v431_v49 = vadd.f32 %v428_v47, %v415_v46  ;;  %v453_v46 = vadd.s32 64, %v2627_v40 }
 0x316   :  { %v2680_v52 = vmul.f32 %v2674_v50, %v2646_v23  ;;  %vm471_vm11 = vcmp.ge.s32.totalorder %v454_v48, %v2685_v55  ;;  %vm489_vm13 = vcmp.lt.s32.totalorder %v454_v48, %v2687_v56 }
 0x317   :  { %1348 = vrot.lane.b32.xlu0 %v2652_v25, %s2544_s24  ;;  %2081 = vmatprep.subr.mxu1 %v431_v49  ;;  %v433_v51 = vmul.f32 %v431_v49, %v2644_v22  ;;  %vm470_vm6 = vcmp.ge.s32.totalorder %v453_v46, %v2685_v55  ;;  %vm488_vm8 = vcmp.lt.s32.totalorder %v453_v46, %v2687_v56 }
 0x318   :  { %2082 = vmatpush3.msra.mxu1 %v431_v49  ;;  %vm504_vm9 = vmand %vm470_vm6, %vm488_vm8  ;;  %vm473_vm8 = vcmp.ge.s32.totalorder %v456_v5, %v2685_v55 }
 0x319   :  { %2107 = vmatprep.subr.mxu0 %v433_v51  ;;  %2084 = vmatmul.mubr.msk.f32.vlgmr.msra.gmra.mrb[4].mxu1 %vm528_vm10, %v2709_v62 }
 0x31a   :  { %2108 = vmatpush3.msra.mxu0 %v433_v51  ;;  %2086 = vmatprep.mubr.msk.f32.mxu1 %vm528_vm10, %v2716_v63  ;;  %v2785_v51 = vsel %vm504_vm9, 1.0, %v2547_v60  ;;  %vm491_vm9 = vcmp.lt.s32.totalorder %v456_v5, %v2687_v56 }
 0x31b   :  { %1351 = vrot.lane.b32.xlu0 %v2652_v25, %s2546_s26  ;;  %2194 = vmatprep.subr.mxu0 %v2680_v52 }
 0x31d   :  { %2087 = vmatmul.mubr.msk.f32.gmra.mrb[6].mxu1 %vm528_vm10, %v2721_v0 }
 0x31e   :  { %2089 = vmatprep.mubr.msk.f32.mxu1 %vm528_vm10, %v2724_v1 }
 0x321   :  { %2090 = vmatmul.mubr.msk.f32.gmra.mrb[8].mxu1 %vm528_vm10, %v2754_v32 }
 0x322   :  { %2092 = vmatprep.mubr.msk.f32.mxu1 %vm528_vm10, %v2768_v41 }
 0x365   :  { %v778_v3 = vpop.permute.xlu1 %777  ;;  %v772_v4 = vpop.permute.xlu0 %771 }
 0x369   :  { %v781_v7 = vpop.permute.xlu1 %780  ;;  %v775_v8 = vpop.permute.xlu0 %774 }
 0x36a   :  { %v792_v9 = vsel %vm64_vm0, %v772_v4, %v775_v8 }
 0x36b   :  { %v793_v10 = vsel %vm167_vm1, %v792_v9, %v778_v3 }
 0x36c   :  { %v795_v11 = vsel %vm794_vm12, %v793_v10, %v781_v7 }
 0x36d   :  { %v796_v12 = vsel %vm326_vm7, %v795_v11, %v2654_v26  ;;  %v784_v13 = vpop.permute.xlu0 %783  ;;  %v787_v14 = vpop.permute.xlu1 %786 }
 0x36e   :  { %v798_v15 = vsel %vm797_vm15, %v796_v12, %v784_v13 }
 0x36f   :  { %v800_v17 = vsel %vm799_vm3, %v798_v15, %v787_v14  ;;  %v457_v15 = vadd.s32 96, %v2627_v40 }
 0x371   :  { %v790_v18 = vpop.permute.xlu0 %789 }
 0x372   :  { %v802_v19 = vsel %vm801_vm4, %v800_v17, %v790_v18  ;;  %v1061_v20 = vsel %vm64_vm0, %v790_v18, %v772_v4 }
 0x373   :  { %v1062_v24 = vsel %vm167_vm1, %v1061_v20, %v775_v8  ;;  %v803_v27 = vmul.f32 %v802_v19, %v2739_v16  ;;  %v458_v19 = vadd.s32 104, %v2627_v40 }
 0x374   :  { %v1063_v28 = vsel %vm794_vm12, %v1062_v24, %v778_v3  ;;  %v460_v24 = vadd.s32 120, %v2627_v40 }
 0x375   :  { %v1064_v29 = vsel %vm326_vm7, %v1063_v28, %v781_v7  ;;  %804 = vxpose.xlu1.b32.start.end [1/1] (short) %v803_v27, 128  ;;  %v1334_v30 = vpop.permute.xlu0 %1333 }
 0x376   :  { %v1065_v31 = vsel %vm797_vm15, %v1064_v29, %v2654_v26  ;;  %v452_v26 = vadd.s32 56, %v2627_v40  ;;  %v1706_v29 = vmul.f32 0.5, %v2631_v44 }
 0x377   :  { %v1066_v33 = vsel %vm799_vm3, %v1065_v31, %v784_v13 }
 0x378   :  { %v1067_v34 = vsel %vm801_vm4, %v1066_v33, %v787_v14  ;;  %vm469_vm14 = vcmp.ge.s32.totalorder %v452_v26, %v2685_v55  ;;  %vm487_vm2 = vcmp.lt.s32.totalorder %v452_v26, %v2687_v56  ;;  %2397 = vtanh.f32 %v1706_v29 }
 0x379   :  { %v2761_v35 = vmul.f32 %v1067_v34, %v2739_v16  ;;  %v1337_v36 = vpop.permute.xlu0 %1336  ;;  %vm503_vm5 = vmand %vm469_vm14, %vm487_vm2  ;;  %vm472_vm2 = vcmp.ge.s32.totalorder %v455_v59, %v2685_v55 }
 0x37a   :  { %v2775_v45 = vsel %vm503_vm5, 1.0, %v2547_v60  ;;  %v1354_v49 = vsel %vm64_vm0, %v1334_v30, %v1337_v36  ;;  %vm505_vm14 = vmand %vm471_vm11, %vm489_vm13  ;;  %vm490_vm5 = vcmp.lt.s32.totalorder %v455_v59, %v2687_v56 }
 0x37b   :  { %2093 = vmatmul.mubr.msk.f32.gmra.mrb[10].mxu1 %vm528_vm10, %v2775_v45  ;;  %v2794_v58 = vsel %vm505_vm14, 1.0, %v2547_v60  ;;  %vm506_vm6 = vmand %vm472_vm2, %vm490_vm5  ;;  %vm477_vm5 = vcmp.ge.s32.totalorder %v460_v24, %v2685_v55 }
 0x37c   :  { %2095 = vmatprep.mubr.msk.f32.mxu1 %vm528_vm10, %v2785_v51  ;;  %v2809_v8 = vsel %vm506_vm6, 1.0, %v2547_v60  ;;  %vm507_vm11 = vmand %vm473_vm8, %vm491_vm9  ;;  %vm495_vm6 = vcmp.lt.s32.totalorder %v460_v24, %v2687_v56  ;;  %vm2549_vm9 = vmmov 0  }
 0x37d   :  { %v1340_v39 = vpop.permute.xlu0 %1339  ;;  %v2820_v13 = vsel %vm507_vm11, 1.0, %v2547_v60  ;;  %vm511_vm8 = vmand %vm477_vm5, %vm495_vm6 }
 0x37e   :  { %v1355_v53 = vsel %vm167_vm1, %v1354_v49, %v1340_v39  ;;  %v2859_v28 = vsel %vm511_vm8, 1.0, %v2547_v60 }
 0x37f   :  { %2096 = vmatmul.mubr.msk.f32.gmra.mrb[12].mxu1 %vm528_vm10, %v2794_v58 }
 0x380   :  { %2098 = vmatprep.mubr.msk.f32.mxu1 %vm528_vm10, %v2809_v8 }
 0x381   :  { %v1343_v43 = vpop.permute.xlu0 %1342 }
 0x382   :  { %v1356_v54 = vsel %vm794_vm12, %v1355_v53, %v1343_v43 }
 0x383   :  { %v1357_v38 = vsel %vm326_vm7, %v1356_v54, %v2652_v25  ;;  %2099 = vmatmul.mubr.msk.f32.gmra.mrb[14].mxu1 %vm528_vm10, %v2820_v13 }
 0x385   :  { %v1346_v47 = vpop.permute.xlu0 %1345 }
 0x386   :  { %v1358_v2 = vsel %vm797_vm15, %v1357_v38, %v1346_v47 }
 0x389   :  { %v1349_v57 = vpop.permute.xlu0 %1348 }
 0x38a   :  { %v1359_v3 = vsel %vm799_vm3, %v1358_v2, %v1349_v57 }
 0x38d   :  { %v1352_v4 = vpop.permute.xlu0 %1351 }
 0x38e   :  { %v1360_v6 = vsel %vm801_vm4, %v1359_v3, %v1352_v4  ;;  %v1619_v7 = vsel %vm64_vm0, %v1352_v4, %v1334_v30  ;;  %vm474_vm0 = vcmp.ge.s32.totalorder %v457_v15, %v2685_v55 }
 0x38f   :  { %v1620_v9 = vsel %vm167_vm1, %v1619_v7, %v1337_v36  ;;  %v1361_v10 = vmul.f32 %v1360_v6, %v2739_v16  ;;  %vm492_vm1 = vcmp.lt.s32.totalorder %v457_v15, %v2687_v56 }
 0x390   :  { %v1621_v11 = vsel %vm794_vm12, %v1620_v9, %v1340_v39  ;;  %vm508_vm12 = vmand %vm474_vm0, %vm492_vm1 }
 0x391   :  { %v1622_v12 = vsel %vm326_vm7, %v1621_v11, %v1343_v43  ;;  %1362 = vxpose.xlu0.b32.start.end [1/1] (short) %v1361_v10, 128 }
 0x392   :  { %v1623_v14 = vsel %vm797_vm15, %v1622_v12, %v2652_v25  ;;  %v2836_v25 = vsel %vm508_vm12, 1.0, %v2547_v60  ;;  %vm475_vm15 = vcmp.ge.s32.totalorder %v458_v19, %v2685_v55 }
 0x393   :  { %v1624_v17 = vsel %vm799_vm3, %v1623_v14, %v1346_v47  ;;  %2101 = vmatprep.mubr.msk.f32.mxu1 %vm528_vm10, %v2836_v25  ;;  %vm493_vm3 = vcmp.lt.s32.totalorder %v458_v19, %v2687_v56 }
 0x394   :  { %v1625_v18 = vsel %vm801_vm4, %v1624_v17, %v1349_v57  ;;  %vm509_vm13 = vmand %vm475_vm15, %vm493_vm3 }
 0x395   :  { %v2833_v20 = vmul.f32 %v1625_v18, %v2739_v16  ;;  %v2843_v21 = vsel %vm509_vm13, 1.0, %v2547_v60  ;;  %v459_v16 = vadd.s32 112, %v2627_v40  ;;  %v2398_v40 = vpop.eup %2397 }
 0x396   :  { %2102 = vmatmul.mubr.msk.f32.gmra.mrb[16].mxu1 %vm528_vm10, %v2843_v21  ;;  %v1710_v30 = vadd.f32 1.0, %v2398_v40 }
 0x397   :  { %vm476_vm4 = vcmp.ge.s32.totalorder %v459_v16, %v2685_v55  ;;  %vm494_vm14 = vcmp.lt.s32.totalorder %v459_v16, %v2687_v56  ;;  %v1707_v55 = vmul.f32 0.5, %v2629_v42 }
 0x398   :  { %vm510_vm2 = vmand %vm476_vm4, %vm494_vm14  ;;  %v1712_v31 = vmul.f32 0.5, %v1710_v30 }
 0x399   :  { %v2852_v27 = vsel %vm510_vm2, 1.0, %v2547_v60  ;;  %2399 = vtanh.f32 %v1707_v55 }
 0x39a   :  { %2104 = vmatprep.mubr.msk.f32.mxu1 %vm528_vm10, %v2852_v27  ;;  %v1714_v33 = vmul.f32 %v1712_v31, %v2631_v44 }
 0x39b   :  { %2105 = vmatmul.mubr.msk.f32.gmra.mrb[18].mxu1 %vm528_vm10, %v2859_v28 }
 0x39c   :  { %2165 = vmatprep.mubr.msk.f32.mxu1 %vm2549_vm9, %v2547_v60 }
 0x3a3   :  { %v2400_v56 = vpop.eup %2399 }
 0x3a4   :  { %v1711_v34 = vadd.f32 1.0, %v2400_v56  ;;  %v2548_v56 = vmov 0.0|0.0  }
 0x3a5   :  { %2302 = vmatprep.subr.bf16.mxu1 %v2548_v56 }
 0x3a6   :  { %v1713_v36 = vmul.f32 0.5, %v1711_v34 }
 0x3a8   :  { %v1715_v37 = vmul.f32 %v1713_v36, %v2629_v42 }
 0x3cf   :  { %1718 = vrot.lane.b32.xlu1 %v1714_v33, %s2541_s21 }
 0x3ec   :  { %v2085_v6 = vpop.f32.mrb[4].mxu1 }
 0x3ed   :  { %v643_v7 = vpop.f32.mrb[5].mxu1 }
 0x3f0   :  { %v2088_v11 = vpop.f32.mrb[6].mxu1 }
 0x3f1   :  { %v653_v12 = vpop.f32.mrb[7].mxu1 }
 0x3f4   :  { %v2091_v30 = vpop.f32.mrb[8].mxu1 }
 0x3f5   :  { %v820_v39 = vpop.trf.xlu1  ;;  %v663_v33 = vpop.f32.mrb[9].mxu1 }
 0x3f6   :  { %2109 = vmatprep.mubr.msk.f32.mxu0 %vm528_vm10, %v820_v39  ;;  %1720 = vrot.lane.b32.xlu0 %v1715_v37, %s2541_s21 }
 0x3f9   :  { %v821_v26 = vpop.trf.xlu1 }
 0x3fa   :  { %2110 = vmatmul.mubr.msk.f32.vlgmr.msra.gmra.mrb[2].mxu0 %vm528_vm10, %v821_v26 }
 0x3fb   :  { %2195 = vmatpush3.msra.mxu0 %v2680_v52 }
 0x3fd   :  { %v822_v44 = vpop.trf.xlu1 }
 0x3fe   :  { %2112 = vmatprep.mubr.msk.f32.mxu0 %vm528_vm10, %v822_v44 }
 0x401   :  { %v823_v43 = vpop.trf.xlu1 }
 0x402   :  { %2113 = vmatmul.mubr.msk.f32.gmra.mrb[4].mxu0 %vm528_vm10, %v823_v43 }
 0x405   :  { %v824_v46 = vpop.trf.xlu1 }
 0x406   :  { %2115 = vmatprep.mubr.msk.f32.mxu0 %vm528_vm10, %v824_v46 }
 0x409   :  { %v825_v42 = vpop.trf.xlu1 }
 0x40a   :  { %2116 = vmatmul.mubr.msk.f32.gmra.mrb[6].mxu0 %vm528_vm10, %v825_v42 }
 0x40d   :  { %v826_v47 = vpop.trf.xlu1 }
 0x40e   :  { %2118 = vmatprep.mubr.msk.f32.mxu0 %vm528_vm10, %v826_v47 }
 0x411   :  { %v827_v48 = vpop.trf.xlu1  ;;  %v1378_v49 = vpop.trf.xlu0 }
 0x412   :  { %2119 = vmatmul.mubr.msk.f32.gmra.mrb[8].mxu0 %vm528_vm10, %v827_v48  ;;  %v2917_v48 = vld [vmem:[#allocation4 + $0x78] sm:$0xff] }
 0x415   :  { %v828_v52 = vpop.trf.xlu1  ;;  %v1379_v53 = vpop.trf.xlu0 }
 0x416   :  { %2121 = vmatprep.mubr.msk.f32.mxu0 %vm528_vm10, %v828_v52  ;;  %v723_v52 = vmul.f32 %v2085_v6, %v2917_v48 }
 0x419   :  { %v829_v54 = vpop.trf.xlu1  ;;  %v1380_v57 = vpop.trf.xlu0 }
 0x41a   :  { %2122 = vmatmul.mubr.msk.f32.gmra.mrb[10].mxu0 %vm528_vm10, %v829_v54  ;;  %v740_v54 = vmul.f32 1.442695, %v723_v52 }
 0x41c   :  { %2401 = vpow2.f32 %v740_v54 }
 0x41d   :  { %v830_v59 = vpop.trf.xlu1  ;;  %v1381_v38 = vpop.trf.xlu0 }
 0x41e   :  { %2124 = vmatprep.mubr.msk.f32.mxu0 %vm528_vm10, %v830_v59  ;;  %v725_v59 = vmul.f32 %v2088_v11, %v2917_v48 }
 0x421   :  { %v831_v2 = vpop.trf.xlu1  ;;  %v1382_v3 = vpop.trf.xlu0 }
 0x422   :  { %2125 = vmatmul.mubr.msk.f32.gmra.mrb[12].mxu0 %vm528_vm10, %v831_v2  ;;  %v744_v2 = vmul.f32 1.442695, %v725_v59 }
 0x425   :  { %v832_v4 = vpop.trf.xlu1  ;;  %v1383_v5 = vpop.trf.xlu0 }
 0x426   :  { %2127 = vmatprep.mubr.msk.f32.mxu0 %vm528_vm10, %v832_v4  ;;  %v727_v4 = vmul.f32 %v2091_v30, %v2917_v48 }
 0x428   :  { %v748_v6 = vmul.f32 1.442695, %v727_v4 }
 0x429   :  { %v833_v9 = vpop.trf.xlu1  ;;  %v1384_v10 = vpop.trf.xlu0 }
 0x42a   :  { %2128 = vmatmul.mubr.msk.f32.gmra.mrb[14].mxu0 %vm528_vm10, %v833_v9  ;;  %v2402_v9 = vpop.eup %2401 }
 0x42d   :  { %v834_v14 = vpop.trf.xlu1  ;;  %v1385_v15 = vpop.trf.xlu0 }
 0x42e   :  { %2130 = vmatprep.mubr.msk.f32.mxu0 %vm528_vm10, %v834_v14  ;;  %v1030_v14 = vmul.f32 0.0, %v2402_v9 }
 0x431   :  { %v835_v17 = vpop.trf.xlu1  ;;  %v1386_v18 = vpop.trf.xlu0 }
 0x432   :  { %2131 = vmatmul.mubr.msk.f32.gmra.mrb[16].mxu0 %vm528_vm10, %v835_v17 }
 0x433   :  { %2196 = vmatprep.mubr.msk.f32.mxu0 %vm528_vm10, %v1378_v49  ;;  %v2919_v49 = vld [vmem:[#allocation4 + $0x70] sm:$0xff] }
 0x435   :  { %v1387_v19 = vpop.trf.xlu0 }
 0x436   :  { %2197 = vmatmul.mubr.msk.f32.vlgmr.msra.gmra.mrb[18].mxu0 %vm528_vm10, %v1379_v53  ;;  %v722_v53 = vmul.f32 %v643_v7, %v2919_v49 }
 0x437   :  { %2199 = vmatprep.mubr.msk.f32.mxu0 %vm528_vm10, %v1380_v57 }
 0x438   :  { %v738_v57 = vmul.f32 1.442695, %v722_v53 }
 0x439   :  { %v1388_v16 = vpop.trf.xlu0 }
 0x43a   :  { %2200 = vmatmul.mubr.msk.f32.gmra.mrb[20].mxu0 %vm528_vm10, %v1381_v38  ;;  %v724_v38 = vmul.f32 %v653_v12, %v2919_v49  ;;  %2403 = vpow2.f32 %v738_v57 }
 0x43b   :  { %2202 = vmatprep.mubr.msk.f32.mxu0 %vm528_vm10, %v1382_v3  ;;  %2405 = vpow2.f32 %v744_v2 }
 0x43c   :  { %v742_v3 = vmul.f32 1.442695, %v724_v38 }
 0x43d   :  { %v1389_v24 = vpop.trf.xlu0 }
 0x43e   :  { %2203 = vmatmul.mubr.msk.f32.gmra.mrb[22].mxu0 %vm528_vm10, %v1383_v5  ;;  %2407 = vpow2.f32 %v742_v3  ;;  %v726_v5 = vmul.f32 %v663_v33, %v2919_v49 }
 0x43f   :  { %2205 = vmatprep.mubr.msk.f32.mxu0 %vm528_vm10, %v1384_v10  ;;  %2409 = vpow2.f32 %v748_v6 }
 0x440   :  { %v746_v7 = vmul.f32 1.442695, %v726_v5 }
 0x441   :  { %v1390_v29 = vpop.trf.xlu0 }
 0x442   :  { %2206 = vmatmul.mubr.msk.f32.gmra.mrb[24].mxu0 %vm528_vm10, %v1385_v15  ;;  %2411 = vpow2.f32 %v746_v7 }
 0x443   :  { %2208 = vmatprep.mubr.msk.f32.mxu0 %vm528_vm10, %v1386_v18 }
 0x444   :  { %v2404_v10 = vpop.eup %2403 }
 0x445   :  { %v1391_v40 = vpop.trf.xlu0  ;;  %v1029_v15 = vmul.f32 0.0, %v2404_v10  ;;  %v2406_v17 = vpop.eup %2405 }
 0x446   :  { %2209 = vmatmul.mubr.msk.f32.gmra.mrb[26].mxu0 %vm528_vm10, %v1387_v19 }
 0x447   :  { %2211 = vmatprep.mubr.msk.f32.mxu0 %vm528_vm10, %v1388_v16 }
 0x448   :  { %v2408_v19 = vpop.eup %2407 }
 0x449   :  { %v1392_v31 = vpop.trf.xlu0 }
 0x44a   :  { %2212 = vmatmul.mubr.msk.f32.gmra.mrb[28].mxu0 %vm528_vm10, %v1389_v24 }
 0x44b   :  { %2214 = vmatprep.mubr.msk.f32.mxu0 %vm528_vm10, %v1390_v29 }
 0x44d   :  { %v1393_v55 = vpop.trf.xlu0 }
 0x44e   :  { %2215 = vmatmul.mubr.msk.f32.gmra.mrb[30].mxu0 %vm528_vm10, %v1391_v40  ;;  %v2094_v34 = vpop.f32.mrb[10].mxu1 }
 0x44f   :  { %2217 = vmatprep.mubr.msk.f32.mxu0 %vm528_vm10, %v1392_v31  ;;  %v673_v36 = vpop.f32.mrb[11].mxu1  ;;  %v729_v11 = vmul.f32 %v2094_v34, %v2917_v48 }
 0x450   :  { %v728_v12 = vmul.f32 %v673_v36, %v2919_v49  ;;  %v2410_v36 = vpop.eup %2409 }
 0x451   :  { %v752_v40 = vmul.f32 1.442695, %v729_v11  ;;  %v2412_v54 = vpop.eup %2411 }
 0x452   :  { %2218 = vmatmul.mubr.msk.f32.gmra.mrb[32].mxu0 %vm528_vm10, %v1393_v55  ;;  %v2097_v37 = vpop.f32.mrb[12].mxu1  ;;  %v750_v30 = vmul.f32 1.442695, %v728_v12 }
 0x453   :  { %v683_v39 = vpop.f32.mrb[13].mxu1  ;;  %2413 = vpow2.f32 %v752_v40  ;;  %v731_v52 = vmul.f32 %v2097_v37, %v2917_v48 }
 0x454   :  { %2415 = vpow2.f32 %v750_v30  ;;  %v730_v34 = vmul.f32 %v683_v39, %v2919_v49 }
 0x455   :  { %v756_v2 = vmul.f32 1.442695, %v731_v52 }
 0x456   :  { %v2903_v26 = vpop.f32.mrb[14].mxu1  ;;  %v754_v3 = vmul.f32 1.442695, %v730_v34 }
 0x457   :  { %v2905_v44 = vpop.f32.mrb[15].mxu1  ;;  %2417 = vpow2.f32 %v756_v2  ;;  %v733_v37 = vmul.f32 %v2903_v26, %v2917_v48 }
 0x458   :  { %2419 = vpow2.f32 %v754_v3  ;;  %v732_v39 = vmul.f32 %v2905_v44, %v2919_v49 }
 0x459   :  { %v760_v12 = vmul.f32 1.442695, %v733_v37 }
 0x45b   :  { %2421 = vpow2.f32 %v760_v12 }
 0x45d   :  { %v2414_v6 = vpop.eup %2413 }
 0x45e   :  { %v2416_v7 = vpop.eup %2415 }
 0x469   :  { %v2907_v43 = vpop.f32.mrb[16].mxu1 }
 0x46a   :  { %v2909_v46 = vpop.f32.mrb[17].mxu1  ;;  %v735_v26 = vmul.f32 %v2907_v43, %v2917_v48 }
 0x46b   :  { %v734_v44 = vmul.f32 %v2909_v46, %v2919_v49 }
 0x46d   :  { %v762_v52 = vmul.f32 1.442695, %v734_v44 }
 0x46e   :  { %v2911_v42 = vpop.f32.mrb[18].mxu1 }
 0x46f   :  { %v2913_v47 = vpop.f32.mrb[19].mxu1  ;;  %v737_v43 = vmul.f32 %v2911_v42, %v2917_v48 }
 0x470   :  { %v736_v46 = vmul.f32 %v2913_v47, %v2919_v49 }
 0x4cd   :  { %v2111_v18 = vpop.f32.mrb[2].mxu0 }
 0x4ce   :  { %v1032_v16 = vadd.f32 %v2111_v18, %v1030_v14  ;;  %v950_v24 = vpop.f32.mrb[3].mxu0 }
 0x4cf   :  { %v1031_v29 = vadd.f32 %v1029_v15, %v950_v24  ;;  %v2418_v24 = vpop.eup %2417 }
 0x4d0   :  { %v1034_v31 = vmul.f32 %v2406_v17, %v1032_v16  ;;  %v758_v17 = vmul.f32 1.442695, %v732_v39  ;;  %v2420_v40 = vpop.eup %2419 }
 0x4d1   :  { %v2303_v33 = vpack.c.bf16 %v1032_v16, %v1031_v29  ;;  %v1033_v55 = vmul.f32 %v2408_v19, %v1031_v29 }
 0x4d2   :  { %2423 = vpow2.f32 %v758_v17 }
 0x4d3   :  { %2304 = vmatpush3.bf16.msra.mxu1 %v2303_v33 }
 0x4d4   :  { %2305 = vmatprep.subr.bf16.mxu1 %v2548_v56 }
 0x4d5   :  { %v2114_v53 = vpop.f32.mrb[4].mxu0 }
 0x4d6   :  { %v1036_v57 = vadd.f32 %v2114_v53, %v1034_v31  ;;  %v960_v59 = vpop.f32.mrb[5].mxu0 }
 0x4d7   :  { %v1035_v38 = vadd.f32 %v1033_v55, %v960_v59  ;;  %v764_v55 = vmul.f32 1.442695, %v735_v26 }
 0x4d8   :  { %v1038_v4 = vmul.f32 %v2410_v36, %v1036_v57 }
 0x4d9   :  { %v2306_v5 = vpack.c.bf16 %v1036_v57, %v1035_v38  ;;  %v1037_v9 = vmul.f32 %v2412_v54, %v1035_v38  ;;  %2425 = vpow2.f32 %v764_v55  ;;  %v2422_v54 = vpop.eup %2421 }
 0x4da   :  { %2427 = vpow2.f32 %v762_v52 }
 0x4db   :  { %2307 = vmatpush3.bf16.msra.mxu1 %v2306_v5  ;;  %v766_v5 = vmul.f32 1.442695, %v736_v46  ;;  %v1731_v46 = vld [vmem:[#allocation4 + $0xa8] sm:$0xff] }
 0x4dc   :  { %2308 = vmatprep.subr.bf16.mxu1 %v2548_v56  ;;  %v2424_v59 = vpop.eup %2423 }
 0x4dd   :  { %v2117_v10 = vpop.f32.mrb[6].mxu0 }
 0x4de   :  { %v1040_v14 = vadd.f32 %v2117_v10, %v1038_v4  ;;  %v970_v15 = vpop.f32.mrb[7].mxu0  ;;  %v768_v4 = vmul.f32 1.442695, %v737_v43  ;;  %v1730_v43 = vld [vmem:[#allocation4 + $0xa0] sm:$0xff] }
 0x4df   :  { %v1039_v11 = vadd.f32 %v1037_v9, %v970_v15 }
 0x4e0   :  { %v1042_v18 = vmul.f32 %v2414_v6, %v1040_v14  ;;  %2429 = vpow2.f32 %v768_v4 }
 0x4e1   :  { %v2309_v19 = vpack.c.bf16 %v1040_v14, %v1039_v11  ;;  %v1041_v16 = vmul.f32 %v2416_v7, %v1039_v11  ;;  %2431 = vpow2.f32 %v766_v5 }
 0x4e3   :  { %2310 = vmatpush3.bf16.msra.mxu1 %v2309_v19  ;;  %v2426_v42 = vpop.eup %2425 }
 0x4e4   :  { %2311 = vmatprep.subr.bf16.mxu1 %v2548_v56  ;;  %v2428_v6 = vpop.eup %2427 }
 0x4e5   :  { %v2120_v29 = vpop.f32.mrb[8].mxu0 }
 0x4e6   :  { %v1044_v30 = vadd.f32 %v2120_v29, %v1042_v18  ;;  %v980_v31 = vpop.f32.mrb[9].mxu0 }
 0x4e7   :  { %v1043_v33 = vadd.f32 %v1041_v16, %v980_v31 }
 0x4e8   :  { %v1046_v34 = vmul.f32 %v2418_v24, %v1044_v30 }
 0x4e9   :  { %v2312_v36 = vpack.c.bf16 %v1044_v30, %v1043_v33  ;;  %v1045_v53 = vmul.f32 %v2420_v40, %v1043_v33 }
 0x4ea   :  { %v2430_v17 = vpop.eup %2429 }
 0x4eb   :  { %2313 = vmatpush3.bf16.msra.mxu1 %v2312_v36  ;;  %v2432_v19 = vpop.eup %2431 }
 0x4ec   :  { %2314 = vmatprep.subr.bf16.mxu1 %v2548_v56 }
 0x4ed   :  { %v2123_v57 = vpop.f32.mrb[10].mxu0 }
 0x4ee   :  { %v1048_v38 = vadd.f32 %v2123_v57, %v1046_v34  ;;  %v990_v2 = vpop.f32.mrb[11].mxu0  ;;  %v1732_v57 = vld [vmem:[#allocation4 + $0xb0] sm:$0xff] }
 0x4ef   :  { %v1047_v3 = vadd.f32 %v1045_v53, %v990_v2  ;;  %v3020_v2 = vld [vmem:[#allocation6 + $0x4] ss:$0 sm:$0xff] }
 0x4f0   :  { %v1050_v9 = vmul.f32 %v2422_v54, %v1048_v38  ;;  %v2358_v54 = vpack.c.bf16 %v1731_v46, %v1730_v43 }
 0x4f1   :  { %v2315_v37 = vpack.c.bf16 %v1048_v38, %v1047_v3  ;;  %v1049_v39 = vmul.f32 %v2424_v59, %v1047_v3  ;;  %v1733_v59 = vld [vmem:[#allocation4 + $0xb8] sm:$0xff]  ;;  %v1702_v3 = vmul.f32 %v3020_v2, %v2644_v22 }
 0x4f2   :  { %v2362_v38 = vpack.c.bf16 %v1733_v59, %v1732_v57 }
 0x4f3   :  { %2316 = vmatpush3.bf16.msra.mxu1 %v2315_v37  ;;  %v1719_v37 = vpop.permute.xlu1 %1718 }
 0x4f4   :  { %2317 = vmatprep.subr.bf16.mxu1 %v2548_v56 }
 0x4f5   :  { %v2126_v47 = vpop.f32.mrb[12].mxu0 }
 0x4f6   :  { %v1052_v10 = vadd.f32 %v2126_v47, %v1050_v9  ;;  %v1000_v7 = vpop.f32.mrb[13].mxu0 }
 0x4f7   :  { %v1051_v14 = vadd.f32 %v1049_v39, %v1000_v7 }
 0x4f8   :  { %v1054_v15 = vmul.f32 %v2426_v42, %v1052_v10 }
 0x4f9   :  { %v2318_v11 = vpack.c.bf16 %v1052_v10, %v1051_v14  ;;  %v1053_v12 = vmul.f32 %v2428_v6, %v1051_v14 }
 0x4fb   :  { %2319 = vmatpush3.bf16.msra.mxu1 %v2318_v11 }
 0x4fc   :  { %2320 = vmatprep.subr.bf16.mxu1 %v2548_v56 }
 0x4fd   :  { %v2129_v18 = vpop.f32.mrb[14].mxu0 }
 0x4fe   :  { %v1056_v16 = vadd.f32 %v2129_v18, %v1054_v15  ;;  %v1010_v26 = vpop.f32.mrb[15].mxu0 }
 0x4ff   :  { %v1055_v44 = vadd.f32 %v1053_v12, %v1010_v26 }
 0x500   :  { %v1058_v24 = vmul.f32 %v2430_v17, %v1056_v16 }
 0x501   :  { %v2321_v29 = vpack.c.bf16 %v1056_v16, %v1055_v44  ;;  %v1057_v40 = vmul.f32 %v2432_v19, %v1055_v44 }
 0x503   :  { %2322 = vmatpush3.bf16.msra.mxu1 %v2321_v29 }
 0x504   :  { %2323 = vmatprep.subr.bf16.mxu1 %v2548_v56 }
 0x505   :  { %v2132_v30 = vpop.f32.mrb[16].mxu0 }
 0x506   :  { %v1060_v31 = vadd.f32 %v2132_v30, %v1058_v24  ;;  %v1020_v33 = vpop.f32.mrb[17].mxu0 }
 0x507   :  { %v1059_v55 = vadd.f32 %v1057_v40, %v1020_v33 }
 0x509   :  { %v2324_v52 = vpack.c.bf16 %v1060_v31, %v1059_v55  ;;  %v2950_v34 = vpop.f32.mrb[18].mxu0 }
 0x50a   :  { %v2952_v36 = vpop.f32.mrb[19].mxu0 }
 0x50b   :  { %2325 = vmatpush3.bf16.msra.mxu1 %v2324_v52 }
 0x50c   :  { %2168 = vmatprep.subr.mxu1 %v2674_v50 }
 0x50e   :  { %2166 = vmatmul.mubr.f32.vlgmr.msra.gmra.mrb[20].mxu1 %v2761_v35 }
 0x50f   :  { %2169 = vmatpush3.msra.mxu1 %v2674_v50  ;;  %2170 = vmatprep.mubr.msk.f32.mxu1 %vm528_vm10, %v2698_v61  ;;  %v2992_v50 = vpop.f32.mrb[20].mxu0 }
 0x510   :  { %2326 = vmatprep.subr.bf16.mxu1 %v2548_v56  ;;  %v2994_v61 = vpop.f32.mrb[21].mxu0 }
 0x512   :  { %2171 = vmatmul.mubr.msk.f32.vlgmr.msra.gmra.mrb[22].mxu1 %vm528_vm10, %v2709_v62  ;;  %v2996_v62 = vpop.f32.mrb[22].mxu0 }
 0x513   :  { %2173 = vmatprep.mubr.msk.f32.mxu1 %vm528_vm10, %v2716_v63  ;;  %v2998_v63 = vpop.f32.mrb[23].mxu0 }
 0x516   :  { %2174 = vmatmul.mubr.msk.f32.gmra.mrb[24].mxu1 %vm528_vm10, %v2721_v0  ;;  %v3000_v0 = vpop.f32.mrb[24].mxu0 }
 0x517   :  { %2176 = vmatprep.mubr.msk.f32.mxu1 %vm528_vm10, %v2724_v1  ;;  %v3002_v1 = vpop.f32.mrb[25].mxu0 }
 0x51a   :  { %2177 = vmatmul.mubr.msk.f32.gmra.mrb[26].mxu1 %vm528_vm10, %v2754_v32  ;;  %v3004_v32 = vpop.f32.mrb[26].mxu0 }
 0x51b   :  { %2179 = vmatprep.mubr.msk.f32.mxu1 %vm528_vm10, %v2768_v41  ;;  %v3006_v35 = vpop.f32.mrb[27].mxu0 }
 0x51d   :  { %v3008_v41 = vpop.f32.mrb[28].mxu0 }
 0x51e   :  { %2180 = vmatmul.mubr.msk.f32.gmra.mrb[28].mxu1 %vm528_vm10, %v2775_v45  ;;  %v3010_v45 = vpop.f32.mrb[29].mxu0 }
 0x51f   :  { %2182 = vmatprep.mubr.msk.f32.mxu1 %vm528_vm10, %v2785_v51 }
 0x522   :  { %2183 = vmatmul.mubr.msk.f32.gmra.mrb[30].mxu1 %vm528_vm10, %v2794_v58 }
 0x523   :  { %2185 = vmatprep.mubr.msk.f32.mxu1 %vm528_vm10, %v2809_v8 }
 0x526   :  { %2186 = vmatmul.mubr.msk.f32.gmra.mrb[32].mxu1 %vm528_vm10, %v2820_v13  ;;  %v1726_v13 = vld [vmem:[#allocation4 + $0x80] sm:$0xff] }
 0x527   :  { %2188 = vmatprep.mubr.msk.f32.mxu1 %vm528_vm10, %v2836_v25  ;;  %v1727_v25 = vld [vmem:[#allocation4 + $0x88] sm:$0xff] }
 0x52a   :  { %2189 = vmatmul.mubr.msk.f32.gmra.mrb[34].mxu1 %vm528_vm10, %v2843_v21  ;;  %v1728_v21 = vld [vmem:[#allocation4 + $0x90] sm:$0xff] }
 0x52b   :  { %2191 = vmatprep.mubr.msk.f32.mxu1 %vm528_vm10, %v2852_v27  ;;  %v2350_v27 = vpack.c.bf16 %v1727_v25, %v1726_v13 }
 0x52d   :  { %2351 = vmatprep.subr.bf16.mxu0 %v2350_v27 }
 0x52e   :  { %2192 = vmatmul.mubr.msk.f32.gmra.mrb[36].mxu1 %vm528_vm10, %v2859_v28  ;;  %v1729_v28 = vld [vmem:[#allocation4 + $0x98] sm:$0xff]  ;;  %2353 = vmatpush3.bf16.msra.mxu0 %v2350_v27 }
 0x52f   :  { %2252 = vmatprep.mubr.msk.f32.mxu1 %vm2549_vm9, %v2547_v60  ;;  %v3012_v60 = vpop.f32.mrb[30].mxu0  ;;  %v2354_v53 = vpack.c.bf16 %v1729_v28, %v1728_v21 }
 0x530   :  { %v3014_v51 = vpop.f32.mrb[31].mxu0 }
 0x531   :  { %v3016_v58 = vpop.f32.mrb[32].mxu0  ;;  %2355 = vmatprep.subr.bf16.mxu0 %v2354_v53 }
 0x532   :  { %v3018_v8 = vpop.f32.mrb[33].mxu0  ;;  %2357 = vmatpush3.bf16.msra.mxu0 %v2354_v53 }
 0x533   :  { %2359 = vmatprep.subr.bf16.mxu0 %v2358_v54 }
 0x536   :  { %2361 = vmatpush3.bf16.msra.mxu0 %v2358_v54 }
 0x537   :  { %2363 = vmatprep.subr.bf16.mxu0 %v2362_v38 }
 0x53a   :  { %2365 = vmatpush3.bf16.msra.mxu0 %v2362_v38 }
 0x5e1   :  { %v1135_v4 = vpop.f32.mrb[20].mxu1 }
 0x5e2   :  { %v1704_v5 = vadd.f32 %v1702_v3, %v1135_v4  ;;  %v2167_v9 = vpop.f32.mrb[21].mxu1 }
 0x5e4   :  { %v1724_v39 = vmul.f32 %v1719_v37, %v1704_v5 }
 0x5e5   :  { %v2172_v42 = vpop.f32.mrb[22].mxu1 }
 0x5e6   :  { %v1285_v47 = vmul.f32 %v2172_v42, %v2917_v48  ;;  %v1205_v6 = vpop.f32.mrb[23].mxu1  ;;  %2271 = vmatprep.mubr.msk.f32.mxu0 %vm326_vm7, %v1724_v39 }
 0x5e7   :  { %v1284_v10 = vmul.f32 %v1205_v6, %v2919_v49 }
 0x5e8   :  { %v1302_v7 = vmul.f32 1.442695, %v1285_v47 }
 0x5e9   :  { %v1300_v14 = vmul.f32 1.442695, %v1284_v10  ;;  %v2175_v15 = vpop.f32.mrb[24].mxu1 }
 0x5ea   :  { %2433 = vpow2.f32 %v1302_v7  ;;  %v1287_v11 = vmul.f32 %v2175_v15, %v2917_v48  ;;  %v1215_v22 = vpop.f32.mrb[25].mxu1 }
 0x5eb   :  { %2435 = vpow2.f32 %v1300_v14  ;;  %v1286_v12 = vmul.f32 %v1215_v22, %v2919_v49 }
 0x5ec   :  { %v1306_v17 = vmul.f32 1.442695, %v1287_v11 }
 0x5ed   :  { %v1304_v18 = vmul.f32 1.442695, %v1286_v12  ;;  %v2178_v19 = vpop.f32.mrb[26].mxu1 }
 0x5ee   :  { %2437 = vpow2.f32 %v1306_v17  ;;  %v1289_v16 = vmul.f32 %v2178_v19, %v2917_v48  ;;  %v1225_v26 = vpop.f32.mrb[27].mxu1 }
 0x5ef   :  { %2439 = vpow2.f32 %v1304_v18  ;;  %v1288_v44 = vmul.f32 %v1225_v26, %v2919_v49 }
 0x5f0   :  { %v1310_v24 = vmul.f32 1.442695, %v1289_v16 }
 0x5f1   :  { %v1308_v29 = vmul.f32 1.442695, %v1288_v44  ;;  %v2181_v40 = vpop.f32.mrb[28].mxu1 }
 0x5f2   :  { %2441 = vpow2.f32 %v1310_v24  ;;  %v1291_v30 = vmul.f32 %v2181_v40, %v2917_v48  ;;  %v1235_v31 = vpop.f32.mrb[29].mxu1 }
 0x5f3   :  { %2443 = vpow2.f32 %v1308_v29  ;;  %v1290_v33 = vmul.f32 %v1235_v31, %v2919_v49 }
 0x5f4   :  { %v2434_v55 = vpop.eup %2433  ;;  %v1314_v52 = vmul.f32 1.442695, %v1291_v30 }
 0x5f5   :  { %v2436_v13 = vpop.eup %2435  ;;  %v1588_v25 = vmul.f32 0.0, %v2434_v55  ;;  %v1312_v21 = vmul.f32 1.442695, %v1290_v33  ;;  %v2184_v27 = vpop.f32.mrb[30].mxu1 }
 0x5f6   :  { %v1587_v28 = vmul.f32 0.0, %v2436_v13  ;;  %2445 = vpow2.f32 %v1314_v52  ;;  %v1293_v53 = vmul.f32 %v2184_v27, %v2917_v48  ;;  %v1245_v43 = vpop.f32.mrb[31].mxu1 }
 0x5f7   :  { %v1590_v46 = vadd.f32 %v2950_v34, %v1588_v25  ;;  %2447 = vpow2.f32 %v1312_v21  ;;  %v1292_v54 = vmul.f32 %v1245_v43, %v2919_v49 }
 0x5f8   :  { %v2438_v57 = vpop.eup %2437  ;;  %v1589_v59 = vadd.f32 %v1587_v28, %v2952_v36  ;;  %v1318_v38 = vmul.f32 1.442695, %v1293_v53 }
 0x5f9   :  { %v2440_v3 = vpop.eup %2439  ;;  %v1592_v4 = vmul.f32 %v2438_v57, %v1590_v46  ;;  %v1316_v5 = vmul.f32 1.442695, %v1292_v54  ;;  %v2187_v9 = vpop.f32.mrb[32].mxu1 }
 0x5fa   :  { %v1591_v37 = vmul.f32 %v2440_v3, %v1589_v59  ;;  %2449 = vpow2.f32 %v1318_v38  ;;  %v1295_v39 = vmul.f32 %v2187_v9, %v2917_v48  ;;  %v1255_v42 = vpop.f32.mrb[33].mxu1  ;;  %v2327_v47 = vpack.c.bf16 %v1590_v46, %v1589_v59 }
 0x5fb   :  { %v1594_v6 = vadd.f32 %v2992_v50, %v1592_v4  ;;  %2451 = vpow2.f32 %v1316_v5  ;;  %v1294_v34 = vmul.f32 %v1255_v42, %v2919_v49 }
 0x5fc   :  { %v2442_v10 = vpop.eup %2441  ;;  %v1593_v7 = vadd.f32 %v1591_v37, %v2994_v61  ;;  %v1322_v36 = vmul.f32 1.442695, %v1295_v39  ;;  %2328 = vmatpush3.bf16.msra.mxu1 %v2327_v47 }
 0x5fd   :  { %v2444_v14 = vpop.eup %2443  ;;  %v1596_v15 = vmul.f32 %v2442_v10, %v1594_v6  ;;  %v1320_v11 = vmul.f32 1.442695, %v1294_v34  ;;  %v2190_v22 = vpop.f32.mrb[34].mxu1  ;;  %2329 = vmatprep.subr.bf16.mxu1 %v2548_v56 }
 0x5fe   :  { %v1595_v12 = vmul.f32 %v2444_v14, %v1593_v7  ;;  %2453 = vpow2.f32 %v1322_v36  ;;  %v1297_v17 = vmul.f32 %v2190_v22, %v2917_v48  ;;  %v1265_v18 = vpop.f32.mrb[35].mxu1  ;;  %v2330_v50 = vpack.c.bf16 %v1594_v6, %v1593_v7 }
 0x5ff   :  { %v1598_v19 = vadd.f32 %v2996_v62, %v1596_v15  ;;  %2455 = vpow2.f32 %v1320_v11  ;;  %v1296_v16 = vmul.f32 %v1265_v18, %v2919_v49  ;;  %v1721_v15 = vpop.permute.xlu0 %1720 }
 0x600   :  { %v2446_v61 = vpop.eup %2445  ;;  %v1597_v26 = vadd.f32 %v1595_v12, %v2998_v63  ;;  %v1326_v44 = vmul.f32 1.442695, %v1297_v17  ;;  %2331 = vmatpush3.bf16.msra.mxu1 %v2330_v50 }
 0x601   :  { %v2448_v24 = vpop.eup %2447  ;;  %v1600_v29 = vmul.f32 %v2446_v61, %v1598_v19  ;;  %v1324_v40 = vmul.f32 1.442695, %v1296_v16  ;;  %v2193_v30 = vpop.f32.mrb[36].mxu1  ;;  %2332 = vmatprep.subr.bf16.mxu1 %v2548_v56 }
 0x602   :  { %v1599_v31 = vmul.f32 %v2448_v24, %v1597_v26  ;;  %v2333_v33 = vpack.c.bf16 %v1598_v19, %v1597_v26  ;;  %2457 = vpow2.f32 %v1326_v44  ;;  %v1299_v55 = vmul.f32 %v2193_v30, %v2917_v48  ;;  %v1275_v62 = vpop.f32.mrb[37].mxu1 }
 0x603   :  { %v1602_v52 = vadd.f32 %v3000_v0, %v1600_v29  ;;  %2459 = vpow2.f32 %v1324_v40  ;;  %v1298_v13 = vmul.f32 %v1275_v62, %v2919_v49 }
 0x604   :  { %v2450_v63 = vpop.eup %2449  ;;  %v1601_v25 = vadd.f32 %v1599_v31, %v3002_v1  ;;  %v1330_v21 = vmul.f32 1.442695, %v1299_v55  ;;  %2334 = vmatpush3.bf16.msra.mxu1 %v2333_v33 }
 0x605   :  { %v2452_v27 = vpop.eup %2451  ;;  %v1604_v28 = vmul.f32 %v2450_v63, %v1602_v52  ;;  %v1328_v53 = vmul.f32 1.442695, %v1298_v13  ;;  %2335 = vmatprep.subr.bf16.mxu1 %v2548_v56 }
 0x606   :  { %v2336_v43 = vpack.c.bf16 %v1602_v52, %v1601_v25  ;;  %v1603_v46 = vmul.f32 %v2452_v27, %v1601_v25  ;;  %2461 = vpow2.f32 %v1330_v21 }
 0x607   :  { %v1606_v48 = vadd.f32 %v3004_v32, %v1604_v28  ;;  %2463 = vpow2.f32 %v1328_v53 }
 0x608   :  { %v2454_v0 = vpop.eup %2453  ;;  %v1605_v54 = vadd.f32 %v1603_v46, %v3006_v35  ;;  %2337 = vmatpush3.bf16.msra.mxu1 %v2336_v43 }
 0x609   :  { %v2456_v49 = vpop.eup %2455  ;;  %v1608_v57 = vmul.f32 %v2454_v0, %v1606_v48  ;;  %2338 = vmatprep.subr.bf16.mxu1 %v2548_v56 }
 0x60a   :  { %v2339_v1 = vpack.c.bf16 %v1606_v48, %v1605_v54  ;;  %v1607_v59 = vmul.f32 %v2456_v49, %v1605_v54 }
 0x60b   :  { %v1610_v38 = vadd.f32 %v3008_v41, %v1608_v57 }
 0x60c   :  { %v2458_v3 = vpop.eup %2457  ;;  %v1609_v4 = vadd.f32 %v1607_v59, %v3010_v45  ;;  %2340 = vmatpush3.bf16.msra.mxu1 %v2339_v1 }
 0x60d   :  { %v2460_v5 = vpop.eup %2459  ;;  %v1612_v9 = vmul.f32 %v2458_v3, %v1610_v38  ;;  %2341 = vmatprep.subr.bf16.mxu1 %v2548_v56 }
 0x60e   :  { %v2342_v32 = vpack.c.bf16 %v1610_v38, %v1609_v4  ;;  %v1611_v37 = vmul.f32 %v2460_v5, %v1609_v4 }
 0x60f   :  { %v1614_v35 = vadd.f32 %v3012_v60, %v1612_v9  ;;  %v1703_v60 = vmul.f32 %v3020_v2, %v2646_v23 }
 0x610   :  { %v2462_v39 = vpop.eup %2461  ;;  %v1613_v42 = vadd.f32 %v1611_v37, %v3014_v51  ;;  %2343 = vmatpush3.bf16.msra.mxu1 %v2342_v32 }
 0x611   :  { %v2464_v47 = vpop.eup %2463  ;;  %v1616_v6 = vmul.f32 %v2462_v39, %v1614_v35  ;;  %2344 = vmatprep.subr.bf16.mxu1 %v2548_v56 }
 0x612   :  { %v2345_v41 = vpack.c.bf16 %v1614_v35, %v1613_v42  ;;  %v1615_v34 = vmul.f32 %v2464_v47, %v1613_v42 }
 0x613   :  { %v1618_v45 = vadd.f32 %v3016_v58, %v1616_v6  ;;  %v1909_v58 = vld [vmem:[#allocation6 + $0x5] ss:$0 sm:$0xff] }
 0x614   :  { %v1617_v10 = vadd.f32 %v1615_v34, %v3018_v8  ;;  %2346 = vmatpush3.bf16.msra.mxu1 %v2345_v41 }
 0x615   :  { %2347 = vmatprep.subr.bf16.mxu1 %v2548_v56 }
 0x616   :  { %v2348_v7 = vpack.c.bf16 %v1618_v45, %v1617_v10 }
 0x618   :  { %2349 = vmatpush3.bf16.msra.mxu1 %v2348_v7 }
 0x61b   :  { %2253 = vmatmul.mubr.f32.vlgmr.msra.gmra.mrb[38].mxu1 %v2833_v20 }
 0x6ee   :  { %v1693_v51 = vpop.f32.mrb[38].mxu1 }
 0x6ef   :  { %v1705_v36 = vadd.f32 %v1703_v60, %v1693_v51  ;;  %v2254_v14 = vpop.f32.mrb[39].mxu1 }
 0x6f1   :  { %v1725_v11 = vmul.f32 %v1721_v15, %v1705_v36 }
 0x6f3   :  { %2272 = vmatmul.mubr.msk.f32.vlgmr.msra.gmra.mrb[34].mxu0 %vm326_vm7, %v1725_v11 }
 0x7c6   :  { %v2273_v22 = vpop.f32.mrb[34].mxu0 }
 0x7c7   :  { %v1817_v8 = vadd.f32 %v2273_v22, %v1909_v58  ;;  %v1811_v12 = vpop.f32.mrb[35].mxu0 }
 0x7c8   :  { %v1812_v17 = vadd.f32 %v1909_v58, %v1811_v12 }
 0x7c9   :  { %1821 = vst.msk [vmem:[%s3079_s3 + $0x8] sm:$0xff] %vm528_vm10, %v1817_v8 }
 0x7ca   :  { %1820 = vst.msk [vmem:[%s3079_s3] sm:$0xff] %vm528_vm10, %v1812_v17 }
 0x7cb   :  { %1826 = vsyncpa [#allocation3], 1 }
 0x7cc   :  { %1827 = vsyncpa [#allocation5], 1 }

</bundles_post_ra>
